<compile_context>
chip_gen: v5e
topology: v5e:2x2
jax: 0.10.0
libtpu: 0.0.40
codegen_flags: <defaults>
</compile_context>

<pallas_src>
import math
import numpy as np
import jax
import jax.numpy as jnp
from jax import lax
from jax.experimental import pallas as pl
from jax.experimental.pallas import tpu as pltpu


# ----------------------------- helpers -------------------------------------

def _round_up(n, m):
    return ((n + m - 1) // m) * m


def _pick_tile(n):
    for c in (512, 256, 128, 64, 32, 16, 8):
        if n % c == 0:
            return c
    return n


def _pad_to(x, shape):
    pads = [(0, s - d) for d, s in zip(x.shape, shape)]
    return jnp.pad(x, pads)


# ----------------------------- Pallas kernels ------------------------------

def _gru_layer_kernel(lens_ref, gi_ref, whh_ref, bhn_ref, out_ref, hfin_ref, h_scratch):
    """Chunk of `Tc` GRU timesteps (gate order r, z, n as in PyTorch nn.GRU).

    gi_ref holds the precomputed bf16 input projection x@W_ih + (b_ih + [b_hr, b_hz, 0]),
    so only the fused hidden matmul h @ W_hh (H, 3H) remains on the sequential path.
    Length masking reproduces pack_padded_sequence / pad_packed_sequence semantics:
    hidden state frozen past each sequence's length, padded outputs zeroed.
    """
    c = pl.program_id(0)
    Tc = gi_ref.shape[0]
    B = h_scratch.shape[0]
    H = whh_ref.shape[0]          # padded hidden size (multiple of 128)

    @pl.when(c == 0)
    def _():
        h_scratch[...] = jnp.zeros_like(h_scratch)

    lens = lens_ref[...]                                   # (B, 1) int32
    w_hh = whh_ref[...]                                    # (H, 3H) bf16, resident
    b_hn = jnp.broadcast_to(bhn_ref[...], (B, H))          # hoisted broadcast
    t0 = c * Tc

    def step(i, h):
        gi = gi_ref[i].astype(jnp.float32)                 # (B, 3H) bf16 -> f32
        gh = jnp.dot(h.astype(jnp.bfloat16), w_hh,
                     preferred_element_type=jnp.float32)   # (B, 3H) f32
        # Fused r/z: one wider VPU add + one EUP pass; slice at 128-lane boundary.
        rz = jax.nn.sigmoid(gi[:, :2 * H] + gh[:, :2 * H])
        r = rz[:, :H]
        z = rz[:, H:]
        n = jnp.tanh(gi[:, 2 * H:] + r * (gh[:, 2 * H:] + b_hn))
        h_new = (1.0 - z) * n + z * h
        mask = (t0 + i) < lens                             # (B, 1) bool
        h_next = jnp.where(mask, h_new, h)                 # freeze past seq end
        out_ref[i] = jnp.where(mask, h_new, 0.0).astype(out_ref.dtype)  # bf16 store
        return h_next

    h = lax.fori_loop(0, Tc, step, h_scratch[...], unroll=min(8, Tc))
    h_scratch[...] = h

    @pl.when(c == pl.num_programs(0) - 1)
    def _():
        hfin_ref[...] = h                                  # hidden at last valid step (f32)


def _linear_kernel(x_ref, w_ref, b_ref, o_ref):
    acc = jnp.dot(x_ref[...], w_ref[...], preferred_element_type=jnp.float32)
    o_ref[...] = (acc + b_ref[...]).astype(o_ref.dtype)


# ----------------------------- kernel wrappers ------------------------------

def gru_layer(gi, lens, w_hh, b_hn, *, time_chunk):
    """gi: (T_pad, B_pad, 3H_pad) bf16, lens: (B_pad, 1) i32, w_hh: (H_pad, 3H_pad) bf16,
    b_hn: (1, H_pad) f32.  Returns ((T_pad, B_pad, H_pad) bf16, (B_pad, H_pad) f32)."""
    T_pad, B_pad, threeH = gi.shape
    H_pad = w_hh.shape[0]
    Tc = time_chunk

    # VMEM budget: double-buffered gi + out chunks, resident W_hh, carries, outputs.
    vmem_bytes = (2 * Tc * B_pad * threeH * 2          # gi chunks (bf16)
                  + 2 * Tc * B_pad * H_pad * 2         # out chunks (bf16)
                  + H_pad * threeH * 2                 # resident W_hh (bf16)
                  + 2 * B_pad * H_pad * 4              # h scratch + final-hidden block
                  + B_pad * 4 + H_pad * 4)             # lens + b_hn
    vmem_limit = int(min(max(vmem_bytes * 1.5 + (1 << 20), 16 << 20), 64 << 20))

    return pl.pallas_call(
        _gru_layer_kernel,
        out_shape=(jax.ShapeDtypeStruct((T_pad, B_pad, H_pad), jnp.bfloat16),
                   jax.ShapeDtypeStruct((B_pad, H_pad), jnp.float32)),
        grid_spec=pltpu.PrefetchScalarGridSpec(
            num_scalar_prefetch=0,
            grid=(T_pad // Tc,),
            in_specs=[
                pl.BlockSpec((B_pad, 1), lambda c: (0, 0)),              # lengths
                pl.BlockSpec((Tc, B_pad, threeH), lambda c: (c, 0, 0)),  # gi chunk
                pl.BlockSpec((H_pad, threeH), lambda c: (0, 0)),         # fused W_hh
                pl.BlockSpec((1, H_pad), lambda c: (0, 0)),              # b_hn
            ],
            out_specs=[
                pl.BlockSpec((Tc, B_pad, H_pad), lambda c: (c, 0, 0)),   # per-step out
                pl.BlockSpec((B_pad, H_pad), lambda c: (0, 0)),          # final hidden
            ],
            scratch_shapes=[pltpu.VMEM((B_pad, H_pad), jnp.float32)],    # carried h
        ),
        compiler_params=pltpu.CompilerParams(
            dimension_semantics=("arbitrary",),          # time chunks are sequential
            vmem_limit_bytes=vmem_limit),
        # TODO(synk): on v7x, once B_pad >= 16 add a 'parallel' batch grid axis so the
        # second TensorCore is fed; at B_pad=8 it would only add padding work.
    )(lens, gi, w_hh, b_hn)


def linear(x2d, w, b, *, out_dtype=jnp.float32):
    """Tiled bf16 GEMM + f32 bias: x2d (N, K), w (K, V), b (1, V) -> (N, V) out_dtype.
    N must be a multiple of 8; K, V multiples of 128 (padded by the caller).
    2-D grid over (row tiles, vocab-column tiles) keeps the weight block ~1-2 MiB."""
    N, K = x2d.shape
    V = w.shape[-1]
    tile_n = _pick_tile(N)
    tile_v = _pick_tile(V)

    vmem_bytes = (2 * tile_n * K * x2d.dtype.itemsize
                  + 2 * K * tile_v * w.dtype.itemsize
                  + 2 * tile_n * tile_v * jnp.dtype(out_dtype).itemsize
                  + 2 * tile_v * 4)
    vmem_limit = int(min(max(vmem_bytes * 1.5 + (1 << 20), 16 << 20), 64 << 20))

    return pl.pallas_call(
        _linear_kernel,
        out_shape=jax.ShapeDtypeStruct((N, V), out_dtype),
        grid_spec=pltpu.PrefetchScalarGridSpec(
            num_scalar_prefetch=0,
            grid=(N // tile_n, V // tile_v),
            in_specs=[pl.BlockSpec((tile_n, K), lambda i, j: (i, 0)),
                      pl.BlockSpec((K, tile_v), lambda i, j: (0, j)),
                      pl.BlockSpec((1, tile_v), lambda i, j: (0, j))],
            out_specs=pl.BlockSpec((tile_n, tile_v), lambda i, j: (i, j)),
        ),
        compiler_params=pltpu.CompilerParams(
            dimension_semantics=("parallel", "parallel"),
            vmem_limit_bytes=vmem_limit),
    )(x2d, w, b)


# ----------------------------- parameters -----------------------------------

def init_params(key, vocab, emb_dim, gru_size, num_layers):
    """Logical (PyTorch-shaped) params mirroring the module's init_weights."""
    init_emb = 0.1
    init_other = 1.0 / math.sqrt(gru_size)
    keys = jax.random.split(key, 2 + 4 * num_layers)
    params = {
        "embedding": jax.random.uniform(keys[0], (vocab, emb_dim), jnp.float32,
                                        -init_emb, init_emb),
        "fc_w": jax.random.uniform(keys[1], (gru_size, vocab), jnp.float32,
                                   -init_other, init_other),
        "fc_b": jnp.zeros((vocab,), jnp.float32),
        "gru": [],
    }
    for l in range(num_layers):
        k = keys[2 + 4 * l: 2 + 4 * (l + 1)]
        in_dim = emb_dim if l == 0 else gru_size
        params["gru"].append((
            jax.random.uniform(k[0], (3, in_dim, gru_size), jnp.float32, -init_other, init_other),
            jax.random.uniform(k[1], (3, gru_size, gru_size), jnp.float32, -init_other, init_other),
            jax.random.uniform(k[2], (3, gru_size), jnp.float32, -init_other, init_other),
            jax.random.uniform(k[3], (3, gru_size), jnp.float32, -init_other, init_other),
        ))
    return params


def prepare_params(params):
    """Fuse gates, fold biases, pad to (8, 128)-aligned shapes, cast weights to bf16.

    Invariant: all padding is exactly zero (and h starts at 0), so padded hidden lanes
    stay 0 through the recurrence; nonzero padding would silently corrupt results.
    """
    V, E = params["embedding"].shape
    H = params["gru"][0][1].shape[-1]
    E_pad, H_pad, V_pad = _round_up(E, 128), _round_up(H, 128), _round_up(V, 128)

    prepared = {
        "embedding": _pad_to(params["embedding"], (V, E_pad)).astype(jnp.bfloat16),
        "fc_w": _pad_to(params["fc_w"], (H_pad, V_pad)).astype(jnp.bfloat16),
        "fc_b": _pad_to(params["fc_b"].reshape(1, -1), (1, V_pad)).astype(jnp.float32),
        "layers": [],
        "dims": (E, H, V, E_pad, H_pad, V_pad),
    }
    for (w_ih, w_hh, b_ih, b_hh) in params["gru"]:
        in_dim = w_ih.shape[1]
        in_pad = _round_up(in_dim, 128)
        # fused [r | z | n] along the output axis, each gate zero-padded to H_pad
        w_ih_f = jnp.concatenate([_pad_to(w_ih[g], (in_pad, H_pad)) for g in range(3)], axis=1)
        w_hh_f = jnp.concatenate([_pad_to(w_hh[g], (H_pad, H_pad)) for g in range(3)], axis=1)
        # biases folded into the hoisted input projection: b_ih + [b_hr, b_hz, 0];
        # only b_hn must stay per-step (it is gated by r).
        b_gi = jnp.concatenate([
            _pad_to((b_ih[0] + b_hh[0]).reshape(1, -1), (1, H_pad)),
            _pad_to((b_ih[1] + b_hh[1]).reshape(1, -1), (1, H_pad)),
            _pad_to(b_ih[2].reshape(1, -1), (1, H_pad)),
        ], axis=1)
        b_hn = _pad_to(b_hh[2].reshape(1, -1), (1, H_pad))
        prepared["layers"].append(dict(
            w_ih=w_ih_f.astype(jnp.bfloat16),
            w_hh=w_hh_f.astype(jnp.bfloat16),
            b_gi=b_gi.astype(jnp.float32),
            b_hn=b_hn.astype(jnp.float32),
        ))
    return prepared


# ----------------------------- forward ---------------------------------------

def gru_forward(prepared, x, x_lens, *, time_chunk=128):
    """x: (B, T) int32 tokens, x_lens: (B,) int32 valid lengths. Fully jittable.
    Returns logits (B, T, V) f32 and (h, c) with h: (num_layers, B, H)."""
    B, T = x.shape
    E, H, V, E_pad, H_pad, V_pad = prepared["dims"]
    B_pad = _round_up(B, 8)
    num_layers = len(prepared["layers"])

    # Time chunk: as big as possible (amortizes per-grid-step overhead, gives the
    # gi/out DMA pipeline runway), clamped by T and by a VMEM budget sized for
    # v7x's 64 MiB/TC (double-buffered bf16 gi + out chunks, resident W_hh, carries).
    Tc = _round_up(min(time_chunk, _round_up(T, 8)), 8)

    def _chunk_bytes(tc):
        return (2 * tc * B_pad * 3 * H_pad * 2    # gi chunks (bf16), double-buffered
                + 2 * tc * B_pad * H_pad * 2)     # out chunks (bf16), double-buffered

    resident = 3 * H_pad * H_pad * 2 + 2 * B_pad * H_pad * 4
    while Tc > 8 and _chunk_bytes(Tc) + resident > (40 << 20):
        Tc = max(8, (Tc // 2 // 8) * 8)
    T_pad = _round_up(T, Tc)

    # Embedding lookup is a gather -> plain-JAX glue; gather time-major directly
    # (no extra activation transpose), bf16 table -> bf16 activations.
    xt = jnp.take(prepared["embedding"], x.T, axis=0)               # (T, B, E_pad) bf16
    xt = jnp.pad(xt, ((0, T_pad - T), (0, B_pad - B), (0, 0)))      # time-major, padded

    lens = jnp.pad(x_lens.astype(jnp.int32), (0, B_pad - B)).reshape(B_pad, 1)

    layer_in = xt                                                    # bf16 throughout
    hs = []
    for lp in prepared["layers"]:
        in_pad = lp["w_ih"].shape[0]
        # Hoisted input projection for ALL timesteps: one MXU bf16 GEMM, bf16 output
        # (halves the recurrent kernel's dominant inbound HBM stream).
        gi = linear(layer_in.reshape(T_pad * B_pad, in_pad),
                    lp["w_ih"], lp["b_gi"], out_dtype=jnp.bfloat16)  # (T_pad*B_pad, 3H_pad)
        gi = gi.reshape(T_pad, B_pad, 3 * H_pad)
        layer_in, h_fin = gru_layer(gi, lens, lp["w_hh"], lp["b_hn"], time_chunk=Tc)
        hs.append(h_fin[:B, :H])
        # TODO(synk): inter-layer dropout omitted (nn.GRU applies it only in training mode).
    h = jnp.stack(hs, axis=0)                                       # (num_layers, B, H)

    # FC over all (padded) positions, in time-major layout (no full-activation HBM
    # transpose); only the trimmed logits get relayouted at the end.
    logits_tm = linear(layer_in.reshape(T_pad * B_pad, H_pad),
                       prepared["fc_w"], prepared["fc_b"], out_dtype=jnp.float32)
    logits_tm = logits_tm.reshape(T_pad, B_pad, V_pad)
    logits = jnp.transpose(logits_tm[:T, :B, :V], (1, 0, 2))        # (B, T, V)

    # TODO(synk): nn.GRU has no cell state; zeros returned to keep the (h, c) tuple structure.
    c = jnp.zeros((num_layers, B, H), jnp.float32)
    return logits, (h, c)


# ----------------------------- pure-JAX reference ----------------------------

def reference_forward(params, x, x_lens):
    """PyTorch packed-sequence GRU semantics, mirroring the kernels' bf16 streams
    (bf16 matmul operands, bf16-stored input projection and per-step outputs)."""
    def bf(v):
        return v.astype(jnp.bfloat16).astype(jnp.float32)

    B, T = x.shape
    num_layers = len(params["gru"])
    H = params["gru"][0][1].shape[-1]
    layer_in = bf(jnp.take(params["embedding"], x, axis=0))
    hs = []
    for (w_ih, w_hh, b_ih, b_hh) in params["gru"]:
        h = jnp.zeros((B, H), jnp.float32)
        outs = []
        for t in range(T):
            x_t = bf(layer_in[:, t])
            hb = bf(h)
            # hoisted input projection is stored in bf16 by the kernel
            gi_r = bf(x_t @ bf(w_ih[0]) + b_ih[0] + b_hh[0])
            gi_z = bf(x_t @ bf(w_ih[1]) + b_ih[1] + b_hh[1])
            gi_n = bf(x_t @ bf(w_ih[2]) + b_ih[2])
            r = jax.nn.sigmoid(gi_r + hb @ bf(w_hh[0]))
            z = jax.nn.sigmoid(gi_z + hb @ bf(w_hh[1]))
            n = jnp.tanh(gi_n + r * (hb @ bf(w_hh[2]) + b_hh[2]))
            h_new = (1.0 - z) * n + z * h
            mask = (t < x_lens)[:, None]
            h = jnp.where(mask, h_new, h)
            outs.append(bf(jnp.where(mask, h_new, 0.0)))            # bf16 output store
        hs.append(h)
        layer_in = jnp.stack(outs, axis=1)
    logits = bf(layer_in) @ bf(params["fc_w"]) + params["fc_b"]
    return logits, (jnp.stack(hs, 0), jnp.zeros((num_layers, B, H), jnp.float32))


# ----------------------------- main ------------------------------------------

if __name__ == "__main__":
    B, T = 2, 8
    gru_size = 32          # hidden size
    emb_dim = 32           # == gru_size (tie_weights assert in the module)
    vocab = 64
    num_layers = 2

    key = jax.random.PRNGKey(0)
    pkey, xkey = jax.random.split(key)
    params = init_params(pkey, vocab, emb_dim, gru_size, num_layers)
    prepared = prepare_params(params)

    x = jax.random.randint(xkey, (B, T), 0, vocab, dtype=jnp.int32)
    x_lens = jnp.array([8, 5], dtype=jnp.int32)

    fwd = jax.jit(lambda xx, ll: gru_forward(prepared, xx, ll))
    outputs, (h, c) = fwd(x, x_lens)
    jax.block_until_ready((outputs, h, c))

    ref_out, (ref_h, _) = reference_forward(params, x, x_lens)

    # pad_packed_sequence trims the time axis to max(x_lens); do it outside jit.
    t_out = int(np.max(np.asarray(x_lens)))
    np.testing.assert_allclose(np.asarray(outputs)[:, :t_out],
                               np.asarray(ref_out)[:, :t_out], rtol=5e-3, atol=5e-3)
    np.testing.assert_allclose(np.asarray(h), np.asarray(ref_h), rtol=5e-3, atol=5e-3)

    print("KERNEL_OK")
</pallas_src>

<mosaic_0001>
module attributes {stable_mosaic.version = 11 : i64} {
  func.func @_gru_layer_kernel(%arg0: i32, %arg1: memref<8x1xi32, #tpu.memory_space<vmem>>, %arg2: memref<8x8x384xbf16, #tpu.memory_space<vmem>>, %arg3: memref<128x384xbf16, #tpu.memory_space<vmem>>, %arg4: memref<1x128xf32, #tpu.memory_space<vmem>>, %arg5: memref<8x8x128xbf16, #tpu.memory_space<vmem>>, %arg6: memref<8x128xf32, #tpu.memory_space<vmem>>, %arg7: memref<8x128xf32, #tpu.memory_space<vmem>>) attributes {dimension_semantics = [#tpu.dimension_semantics<arbitrary>], iteration_bounds = array<i64: 1>, scalar_prefetch = 0 : i64, scratch_operands = 1 : i64, tpu.core_type = #tpu.core_type<tc>, window_params = [{pipeline_mode = #tpu.pipeline_mode<synchronous>, transform_indices = @transform_0, window_bounds = array<i64: 8, 1>}, {transform_indices = @transform_1, window_bounds = array<i64: 8, 8, 384>}, {pipeline_mode = #tpu.pipeline_mode<synchronous>, transform_indices = @transform_2, window_bounds = array<i64: 128, 384>}, {pipeline_mode = #tpu.pipeline_mode<synchronous>, transform_indices = @transform_3, window_bounds = array<i64: 1, 128>}, {transform_indices = @transform_4, window_bounds = array<i64: 8, 8, 128>}, {pipeline_mode = #tpu.pipeline_mode<synchronous>, transform_indices = @transform_5, window_bounds = array<i64: 8, 128>}]} {
    %c0_i32 = arith.constant 0 : i32
    %0 = arith.cmpi eq, %arg0, %c0_i32 : i32
    %1 = arith.extui %0 : i1 to i32
    %c0_i32_0 = arith.constant 0 : i32
    %2 = arith.cmpi ne, %1, %c0_i32_0 : i32
    scf.if %2 {
      %cst_77 = arith.constant 0.000000e+00 : f32
      %350 = vector.broadcast %cst_77 : f32 to vector<8x128xf32>
      %c0_78 = arith.constant 0 : index
      %c0_79 = arith.constant 0 : index
      %351 = vector.load %arg7[%c0_78, %c0_79] : memref<8x128xf32, #tpu.memory_space<vmem>>, vector<8x128xf32>
      tpu.vector_store %arg7[%c0_78, %c0_79], %350 {strides = array<i32>} : memref<8x128xf32, #tpu.memory_space<vmem>>, vector<8x128xf32>,
    } else {
    }
    %c0 = arith.constant 0 : index
    %c0_1 = arith.constant 0 : index
    %3 = vector.load %arg1[%c0, %c0_1] : memref<8x1xi32, #tpu.memory_space<vmem>>, vector<8x1xi32>
    %c0_2 = arith.constant 0 : index
    %c0_3 = arith.constant 0 : index
    %4 = vector.load %arg3[%c0_2, %c0_3] : memref<128x384xbf16, #tpu.memory_space<vmem>>, vector<128x384xbf16>
    %c0_4 = arith.constant 0 : index
    %c0_5 = arith.constant 0 : index
    %5 = vector.load %arg4[%c0_4, %c0_5] : memref<1x128xf32, #tpu.memory_space<vmem>>, vector<1x128xf32>
    %6 = vector.shape_cast %5 : vector<1x128xf32> to vector<1x128xf32>
    %7 = vector.broadcast %6 : vector<1x128xf32> to vector<8x128xf32>
    %c8_i32 = arith.constant 8 : i32
    %8 = arith.muli %arg0, %c8_i32 : i32
    %c0_6 = arith.constant 0 : index
    %c0_7 = arith.constant 0 : index
    %9 = vector.load %arg7[%c0_6, %c0_7] : memref<8x128xf32, #tpu.memory_space<vmem>>, vector<8x128xf32>
    %c0_i32_8 = arith.constant 0 : i32
    %10 = arith.index_cast %c0_i32_8 : i32 to index
    %c0_9 = arith.constant 0 : index
    %c0_10 = arith.constant 0 : index
    %11 = vector.load %arg2[%10, %c0_9, %c0_10] : memref<8x8x384xbf16, #tpu.memory_space<vmem>>, vector<1x8x384xbf16>
    %12 = vector.shape_cast %11 : vector<1x8x384xbf16> to vector<8x384xbf16>
    %13 = arith.extf %12 : vector<8x384xbf16> to vector<8x384xf32>
    %14 = arith.truncf %9 : vector<8x128xf32> to vector<8x128xbf16>
    %cst = arith.constant dense<0.000000e+00> : vector<8x384xf32>
    %15 = tpu.matmul %14, %4, %cst {dimension_numbers = #tpu.dot_dimension_numbers<[1], [0], [0], [1], [0, 0, 1, 1], [], []>} : vector<8x128xbf16>, vector<128x384xbf16>, vector<8x384xf32> -> vector<8x384xf32>
    %16 = vector.extract_strided_slice %13 {offsets = [0, 0], sizes = [8, 256], strides = [1, 1]} : vector<8x384xf32> to vector<8x256xf32>
    %17 = vector.extract_strided_slice %15 {offsets = [0, 0], sizes = [8, 256], strides = [1, 1]} : vector<8x384xf32> to vector<8x256xf32>
    %18 = arith.addf %16, %17 : vector<8x256xf32>
    %19 = arith.negf %18 : vector<8x256xf32>
    %20 = math.exp %19 : vector<8x256xf32>
    %cst_11 = arith.constant 1.000000e+00 : f32
    %21 = vector.broadcast %cst_11 : f32 to vector<8x256xf32>
    %22 = arith.addf %21, %20 : vector<8x256xf32>
    %23 = arith.divf %21, %22 : vector<8x256xf32>
    %24 = vector.extract_strided_slice %23 {offsets = [0, 0], sizes = [8, 128], strides = [1, 1]} : vector<8x256xf32> to vector<8x128xf32>
    %25 = vector.extract_strided_slice %23 {offsets = [0, 128], sizes = [8, 128], strides = [1, 1]} : vector<8x256xf32> to vector<8x128xf32>
    %26 = vector.extract_strided_slice %13 {offsets = [0, 256], sizes = [8, 128], strides = [1, 1]} : vector<8x384xf32> to vector<8x128xf32>
    %27 = vector.extract_strided_slice %15 {offsets = [0, 256], sizes = [8, 128], strides = [1, 1]} : vector<8x384xf32> to vector<8x128xf32>
    %28 = arith.addf %27, %7 : vector<8x128xf32>
    %29 = arith.mulf %24, %28 : vector<8x128xf32>
    %30 = arith.addf %26, %29 : vector<8x128xf32>
    %31 = math.tanh %30 : vector<8x128xf32>
    %cst_12 = arith.constant 1.000000e+00 : f32
    %32 = vector.broadcast %cst_12 : f32 to vector<8x128xf32>
    %33 = arith.subf %32, %25 : vector<8x128xf32>
    %34 = arith.mulf %33, %31 : vector<8x128xf32>
    %35 = arith.mulf %25, %9 : vector<8x128xf32>
    %36 = arith.addf %34, %35 : vector<8x128xf32>
    %37 = arith.addi %8, %c0_i32_8 : i32
    %38 = vector.broadcast %37 : i32 to vector<8x1xi32>
    %39 = arith.cmpi slt, %38, %3 : vector<8x1xi32>
    %40 = vector.shape_cast %39 : vector<8x1xi1> to vector<8x1xi1>
    %41 = vector.broadcast %40 : vector<8x1xi1> to vector<8x128xi1>
    %42 = arith.select %41, %36, %9 : vector<8x128xi1>, vector<8x128xf32>
    %cst_13 = arith.constant 0.000000e+00 : f32
    %43 = vector.shape_cast %39 : vector<8x1xi1> to vector<8x1xi1>
    %44 = vector.broadcast %43 : vector<8x1xi1> to vector<8x128xi1>
    %45 = vector.broadcast %cst_13 : f32 to vector<8x128xf32>
    %46 = arith.select %44, %36, %45 : vector<8x128xi1>, vector<8x128xf32>
    %47 = arith.truncf %46 : vector<8x128xf32> to vector<8x128xbf16>
    %48 = arith.index_cast %c0_i32_8 : i32 to index
    %c0_14 = arith.constant 0 : index
    %c0_15 = arith.constant 0 : index
    %49 = vector.load %arg5[%48, %c0_14, %c0_15] : memref<8x8x128xbf16, #tpu.memory_space<vmem>>, vector<1x8x128xbf16>
    %50 = vector.shape_cast %49 : vector<1x8x128xbf16> to vector<8x128xbf16>
    %51 = vector.shape_cast %47 : vector<8x128xbf16> to vector<1x8x128xbf16>
    tpu.vector_store %arg5[%48, %c0_14, %c0_15], %51 {strides = array<i32>} : memref<8x8x128xbf16, #tpu.memory_space<vmem>>, vector<1x8x128xbf16>,
    %c1_i32 = arith.constant 1 : i32
    %52 = arith.index_cast %c1_i32 : i32 to index
    %c0_16 = arith.constant 0 : index
    %c0_17 = arith.constant 0 : index
    %53 = vector.load %arg2[%52, %c0_16, %c0_17] : memref<8x8x384xbf16, #tpu.memory_space<vmem>>, vector<1x8x384xbf16>
    %54 = vector.shape_cast %53 : vector<1x8x384xbf16> to vector<8x384xbf16>
    %55 = arith.extf %54 : vector<8x384xbf16> to vector<8x384xf32>
    %56 = arith.truncf %42 : vector<8x128xf32> to vector<8x128xbf16>
    %cst_18 = arith.constant dense<0.000000e+00> : vector<8x384xf32>
    %57 = tpu.matmul %56, %4, %cst_18 {dimension_numbers = #tpu.dot_dimension_numbers<[1], [0], [0], [1], [0, 0, 1, 1], [], []>} : vector<8x128xbf16>, vector<128x384xbf16>, vector<8x384xf32> -> vector<8x384xf32>
    %58 = vector.extract_strided_slice %55 {offsets = [0, 0], sizes = [8, 256], strides = [1, 1]} : vector<8x384xf32> to vector<8x256xf32>
    %59 = vector.extract_strided_slice %57 {offsets = [0, 0], sizes = [8, 256], strides = [1, 1]} : vector<8x384xf32> to vector<8x256xf32>
    %60 = arith.addf %58, %59 : vector<8x256xf32>
    %61 = arith.negf %60 : vector<8x256xf32>
    %62 = math.exp %61 : vector<8x256xf32>
    %cst_19 = arith.constant 1.000000e+00 : f32
    %63 = vector.broadcast %cst_19 : f32 to vector<8x256xf32>
    %64 = arith.addf %63, %62 : vector<8x256xf32>
    %65 = arith.divf %63, %64 : vector<8x256xf32>
    %66 = vector.extract_strided_slice %65 {offsets = [0, 0], sizes = [8, 128], strides = [1, 1]} : vector<8x256xf32> to vector<8x128xf32>
    %67 = vector.extract_strided_slice %65 {offsets = [0, 128], sizes = [8, 128], strides = [1, 1]} : vector<8x256xf32> to vector<8x128xf32>
    %68 = vector.extract_strided_slice %55 {offsets = [0, 256], sizes = [8, 128], strides = [1, 1]} : vector<8x384xf32> to vector<8x128xf32>
    %69 = vector.extract_strided_slice %57 {offsets = [0, 256], sizes = [8, 128], strides = [1, 1]} : vector<8x384xf32> to vector<8x128xf32>
    %70 = arith.addf %69, %7 : vector<8x128xf32>
    %71 = arith.mulf %66, %70 : vector<8x128xf32>
    %72 = arith.addf %68, %71 : vector<8x128xf32>
    %73 = math.tanh %72 : vector<8x128xf32>
    %cst_20 = arith.constant 1.000000e+00 : f32
    %74 = vector.broadcast %cst_20 : f32 to vector<8x128xf32>
    %75 = arith.subf %74, %67 : vector<8x128xf32>
    %76 = arith.mulf %75, %73 : vector<8x128xf32>
    %77 = arith.mulf %67, %42 : vector<8x128xf32>
    %78 = arith.addf %76, %77 : vector<8x128xf32>
    %79 = arith.addi %8, %c1_i32 : i32
    %80 = vector.broadcast %79 : i32 to vector<8x1xi32>
    %81 = arith.cmpi slt, %80, %3 : vector<8x1xi32>
    %82 = vector.shape_cast %81 : vector<8x1xi1> to vector<8x1xi1>
    %83 = vector.broadcast %82 : vector<8x1xi1> to vector<8x128xi1>
    %84 = arith.select %83, %78, %42 : vector<8x128xi1>, vector<8x128xf32>
    %cst_21 = arith.constant 0.000000e+00 : f32
    %85 = vector.shape_cast %81 : vector<8x1xi1> to vector<8x1xi1>
    %86 = vector.broadcast %85 : vector<8x1xi1> to vector<8x128xi1>
    %87 = vector.broadcast %cst_21 : f32 to vector<8x128xf32>
    %88 = arith.select %86, %78, %87 : vector<8x128xi1>, vector<8x128xf32>
    %89 = arith.truncf %88 : vector<8x128xf32> to vector<8x128xbf16>
    %90 = arith.index_cast %c1_i32 : i32 to index
    %c0_22 = arith.constant 0 : index
    %c0_23 = arith.constant 0 : index
    %91 = vector.load %arg5[%90, %c0_22, %c0_23] : memref<8x8x128xbf16, #tpu.memory_space<vmem>>, vector<1x8x128xbf16>
    %92 = vector.shape_cast %91 : vector<1x8x128xbf16> to vector<8x128xbf16>
    %93 = vector.shape_cast %89 : vector<8x128xbf16> to vector<1x8x128xbf16>
    tpu.vector_store %arg5[%90, %c0_22, %c0_23], %93 {strides = array<i32>} : memref<8x8x128xbf16, #tpu.memory_space<vmem>>, vector<1x8x128xbf16>,
    %c2_i32 = arith.constant 2 : i32
    %94 = arith.index_cast %c2_i32 : i32 to index
    %c0_24 = arith.constant 0 : index
    %c0_25 = arith.constant 0 : index
    %95 = vector.load %arg2[%94, %c0_24, %c0_25] : memref<8x8x384xbf16, #tpu.memory_space<vmem>>, vector<1x8x384xbf16>
    %96 = vector.shape_cast %95 : vector<1x8x384xbf16> to vector<8x384xbf16>
    %97 = arith.extf %96 : vector<8x384xbf16> to vector<8x384xf32>
    %98 = arith.truncf %84 : vector<8x128xf32> to vector<8x128xbf16>
    %cst_26 = arith.constant dense<0.000000e+00> : vector<8x384xf32>
    %99 = tpu.matmul %98, %4, %cst_26 {dimension_numbers = #tpu.dot_dimension_numbers<[1], [0], [0], [1], [0, 0, 1, 1], [], []>} : vector<8x128xbf16>, vector<128x384xbf16>, vector<8x384xf32> -> vector<8x384xf32>
    %100 = vector.extract_strided_slice %97 {offsets = [0, 0], sizes = [8, 256], strides = [1, 1]} : vector<8x384xf32> to vector<8x256xf32>
    %101 = vector.extract_strided_slice %99 {offsets = [0, 0], sizes = [8, 256], strides = [1, 1]} : vector<8x384xf32> to vector<8x256xf32>
    %102 = arith.addf %100, %101 : vector<8x256xf32>
    %103 = arith.negf %102 : vector<8x256xf32>
    %104 = math.exp %103 : vector<8x256xf32>
    %cst_27 = arith.constant 1.000000e+00 : f32
    %105 = vector.broadcast %cst_27 : f32 to vector<8x256xf32>
    %106 = arith.addf %105, %104 : vector<8x256xf32>
    %107 = arith.divf %105, %106 : vector<8x256xf32>
    %108 = vector.extract_strided_slice %107 {offsets = [0, 0], sizes = [8, 128], strides = [1, 1]} : vector<8x256xf32> to vector<8x128xf32>
    %109 = vector.extract_strided_slice %107 {offsets = [0, 128], sizes = [8, 128], strides = [1, 1]} : vector<8x256xf32> to vector<8x128xf32>
    %110 = vector.extract_strided_slice %97 {offsets = [0, 256], sizes = [8, 128], strides = [1, 1]} : vector<8x384xf32> to vector<8x128xf32>
    %111 = vector.extract_strided_slice %99 {offsets = [0, 256], sizes = [8, 128], strides = [1, 1]} : vector<8x384xf32> to vector<8x128xf32>
    %112 = arith.addf %111, %7 : vector<8x128xf32>
    %113 = arith.mulf %108, %112 : vector<8x128xf32>
    %114 = arith.addf %110, %113 : vector<8x128xf32>
    %115 = math.tanh %114 : vector<8x128xf32>
    %cst_28 = arith.constant 1.000000e+00 : f32
    %116 = vector.broadcast %cst_28 : f32 to vector<8x128xf32>
    %117 = arith.subf %116, %109 : vector<8x128xf32>
    %118 = arith.mulf %117, %115 : vector<8x128xf32>
    %119 = arith.mulf %109, %84 : vector<8x128xf32>
    %120 = arith.addf %118, %119 : vector<8x128xf32>
    %121 = arith.addi %8, %c2_i32 : i32
    %122 = vector.broadcast %121 : i32 to vector<8x1xi32>
    %123 = arith.cmpi slt, %122, %3 : vector<8x1xi32>
    %124 = vector.shape_cast %123 : vector<8x1xi1> to vector<8x1xi1>
    %125 = vector.broadcast %124 : vector<8x1xi1> to vector<8x128xi1>
    %126 = arith.select %125, %120, %84 : vector<8x128xi1>, vector<8x128xf32>
    %cst_29 = arith.constant 0.000000e+00 : f32
    %127 = vector.shape_cast %123 : vector<8x1xi1> to vector<8x1xi1>
    %128 = vector.broadcast %127 : vector<8x1xi1> to vector<8x128xi1>
    %129 = vector.broadcast %cst_29 : f32 to vector<8x128xf32>
    %130 = arith.select %128, %120, %129 : vector<8x128xi1>, vector<8x128xf32>
    %131 = arith.truncf %130 : vector<8x128xf32> to vector<8x128xbf16>
    %132 = arith.index_cast %c2_i32 : i32 to index
    %c0_30 = arith.constant 0 : index
    %c0_31 = arith.constant 0 : index
    %133 = vector.load %arg5[%132, %c0_30, %c0_31] : memref<8x8x128xbf16, #tpu.memory_space<vmem>>, vector<1x8x128xbf16>
    %134 = vector.shape_cast %133 : vector<1x8x128xbf16> to vector<8x128xbf16>
    %135 = vector.shape_cast %131 : vector<8x128xbf16> to vector<1x8x128xbf16>
    tpu.vector_store %arg5[%132, %c0_30, %c0_31], %135 {strides = array<i32>} : memref<8x8x128xbf16, #tpu.memory_space<vmem>>, vector<1x8x128xbf16>,
    %c3_i32 = arith.constant 3 : i32
    %136 = arith.index_cast %c3_i32 : i32 to index
    %c0_32 = arith.constant 0 : index
    %c0_33 = arith.constant 0 : index
    %137 = vector.load %arg2[%136, %c0_32, %c0_33] : memref<8x8x384xbf16, #tpu.memory_space<vmem>>, vector<1x8x384xbf16>
    %138 = vector.shape_cast %137 : vector<1x8x384xbf16> to vector<8x384xbf16>
    %139 = arith.extf %138 : vector<8x384xbf16> to vector<8x384xf32>
    %140 = arith.truncf %126 : vector<8x128xf32> to vector<8x128xbf16>
    %cst_34 = arith.constant dense<0.000000e+00> : vector<8x384xf32>
    %141 = tpu.matmul %140, %4, %cst_34 {dimension_numbers = #tpu.dot_dimension_numbers<[1], [0], [0], [1], [0, 0, 1, 1], [], []>} : vector<8x128xbf16>, vector<128x384xbf16>, vector<8x384xf32> -> vector<8x384xf32>
    %142 = vector.extract_strided_slice %139 {offsets = [0, 0], sizes = [8, 256], strides = [1, 1]} : vector<8x384xf32> to vector<8x256xf32>
    %143 = vector.extract_strided_slice %141 {offsets = [0, 0], sizes = [8, 256], strides = [1, 1]} : vector<8x384xf32> to vector<8x256xf32>
    %144 = arith.addf %142, %143 : vector<8x256xf32>
    %145 = arith.negf %144 : vector<8x256xf32>
    %146 = math.exp %145 : vector<8x256xf32>
    %cst_35 = arith.constant 1.000000e+00 : f32
    %147 = vector.broadcast %cst_35 : f32 to vector<8x256xf32>
    %148 = arith.addf %147, %146 : vector<8x256xf32>
    %149 = arith.divf %147, %148 : vector<8x256xf32>
    %150 = vector.extract_strided_slice %149 {offsets = [0, 0], sizes = [8, 128], strides = [1, 1]} : vector<8x256xf32> to vector<8x128xf32>
    %151 = vector.extract_strided_slice %149 {offsets = [0, 128], sizes = [8, 128], strides = [1, 1]} : vector<8x256xf32> to vector<8x128xf32>
    %152 = vector.extract_strided_slice %139 {offsets = [0, 256], sizes = [8, 128], strides = [1, 1]} : vector<8x384xf32> to vector<8x128xf32>
    %153 = vector.extract_strided_slice %141 {offsets = [0, 256], sizes = [8, 128], strides = [1, 1]} : vector<8x384xf32> to vector<8x128xf32>
    %154 = arith.addf %153, %7 : vector<8x128xf32>
    %155 = arith.mulf %150, %154 : vector<8x128xf32>
    %156 = arith.addf %152, %155 : vector<8x128xf32>
    %157 = math.tanh %156 : vector<8x128xf32>
    %cst_36 = arith.constant 1.000000e+00 : f32
    %158 = vector.broadcast %cst_36 : f32 to vector<8x128xf32>
    %159 = arith.subf %158, %151 : vector<8x128xf32>
    %160 = arith.mulf %159, %157 : vector<8x128xf32>
    %161 = arith.mulf %151, %126 : vector<8x128xf32>
    %162 = arith.addf %160, %161 : vector<8x128xf32>
    %163 = arith.addi %8, %c3_i32 : i32
    %164 = vector.broadcast %163 : i32 to vector<8x1xi32>
    %165 = arith.cmpi slt, %164, %3 : vector<8x1xi32>
    %166 = vector.shape_cast %165 : vector<8x1xi1> to vector<8x1xi1>
    %167 = vector.broadcast %166 : vector<8x1xi1> to vector<8x128xi1>
    %168 = arith.select %167, %162, %126 : vector<8x128xi1>, vector<8x128xf32>
    %cst_37 = arith.constant 0.000000e+00 : f32
    %169 = vector.shape_cast %165 : vector<8x1xi1> to vector<8x1xi1>
    %170 = vector.broadcast %169 : vector<8x1xi1> to vector<8x128xi1>
    %171 = vector.broadcast %cst_37 : f32 to vector<8x128xf32>
    %172 = arith.select %170, %162, %171 : vector<8x128xi1>, vector<8x128xf32>
    %173 = arith.truncf %172 : vector<8x128xf32> to vector<8x128xbf16>
    %174 = arith.index_cast %c3_i32 : i32 to index
    %c0_38 = arith.constant 0 : index
    %c0_39 = arith.constant 0 : index
    %175 = vector.load %arg5[%174, %c0_38, %c0_39] : memref<8x8x128xbf16, #tpu.memory_space<vmem>>, vector<1x8x128xbf16>
    %176 = vector.shape_cast %175 : vector<1x8x128xbf16> to vector<8x128xbf16>
    %177 = vector.shape_cast %173 : vector<8x128xbf16> to vector<1x8x128xbf16>
    tpu.vector_store %arg5[%174, %c0_38, %c0_39], %177 {strides = array<i32>} : memref<8x8x128xbf16, #tpu.memory_space<vmem>>, vector<1x8x128xbf16>,
    %c4_i32 = arith.constant 4 : i32
    %178 = arith.index_cast %c4_i32 : i32 to index
    %c0_40 = arith.constant 0 : index
    %c0_41 = arith.constant 0 : index
    %179 = vector.load %arg2[%178, %c0_40, %c0_41] : memref<8x8x384xbf16, #tpu.memory_space<vmem>>, vector<1x8x384xbf16>
    %180 = vector.shape_cast %179 : vector<1x8x384xbf16> to vector<8x384xbf16>
    %181 = arith.extf %180 : vector<8x384xbf16> to vector<8x384xf32>
    %182 = arith.truncf %168 : vector<8x128xf32> to vector<8x128xbf16>
    %cst_42 = arith.constant dense<0.000000e+00> : vector<8x384xf32>
    %183 = tpu.matmul %182, %4, %cst_42 {dimension_numbers = #tpu.dot_dimension_numbers<[1], [0], [0], [1], [0, 0, 1, 1], [], []>} : vector<8x128xbf16>, vector<128x384xbf16>, vector<8x384xf32> -> vector<8x384xf32>
    %184 = vector.extract_strided_slice %181 {offsets = [0, 0], sizes = [8, 256], strides = [1, 1]} : vector<8x384xf32> to vector<8x256xf32>
    %185 = vector.extract_strided_slice %183 {offsets = [0, 0], sizes = [8, 256], strides = [1, 1]} : vector<8x384xf32> to vector<8x256xf32>
    %186 = arith.addf %184, %185 : vector<8x256xf32>
    %187 = arith.negf %186 : vector<8x256xf32>
    %188 = math.exp %187 : vector<8x256xf32>
    %cst_43 = arith.constant 1.000000e+00 : f32
    %189 = vector.broadcast %cst_43 : f32 to vector<8x256xf32>
    %190 = arith.addf %189, %188 : vector<8x256xf32>
    %191 = arith.divf %189, %190 : vector<8x256xf32>
    %192 = vector.extract_strided_slice %191 {offsets = [0, 0], sizes = [8, 128], strides = [1, 1]} : vector<8x256xf32> to vector<8x128xf32>
    %193 = vector.extract_strided_slice %191 {offsets = [0, 128], sizes = [8, 128], strides = [1, 1]} : vector<8x256xf32> to vector<8x128xf32>
    %194 = vector.extract_strided_slice %181 {offsets = [0, 256], sizes = [8, 128], strides = [1, 1]} : vector<8x384xf32> to vector<8x128xf32>
    %195 = vector.extract_strided_slice %183 {offsets = [0, 256], sizes = [8, 128], strides = [1, 1]} : vector<8x384xf32> to vector<8x128xf32>
    %196 = arith.addf %195, %7 : vector<8x128xf32>
    %197 = arith.mulf %192, %196 : vector<8x128xf32>
    %198 = arith.addf %194, %197 : vector<8x128xf32>
    %199 = math.tanh %198 : vector<8x128xf32>
    %cst_44 = arith.constant 1.000000e+00 : f32
    %200 = vector.broadcast %cst_44 : f32 to vector<8x128xf32>
    %201 = arith.subf %200, %193 : vector<8x128xf32>
    %202 = arith.mulf %201, %199 : vector<8x128xf32>
    %203 = arith.mulf %193, %168 : vector<8x128xf32>
    %204 = arith.addf %202, %203 : vector<8x128xf32>
    %205 = arith.addi %8, %c4_i32 : i32
    %206 = vector.broadcast %205 : i32 to vector<8x1xi32>
    %207 = arith.cmpi slt, %206, %3 : vector<8x1xi32>
    %208 = vector.shape_cast %207 : vector<8x1xi1> to vector<8x1xi1>
    %209 = vector.broadcast %208 : vector<8x1xi1> to vector<8x128xi1>
    %210 = arith.select %209, %204, %168 : vector<8x128xi1>, vector<8x128xf32>
    %cst_45 = arith.constant 0.000000e+00 : f32
    %211 = vector.shape_cast %207 : vector<8x1xi1> to vector<8x1xi1>
    %212 = vector.broadcast %211 : vector<8x1xi1> to vector<8x128xi1>
    %213 = vector.broadcast %cst_45 : f32 to vector<8x128xf32>
    %214 = arith.select %212, %204, %213 : vector<8x128xi1>, vector<8x128xf32>
    %215 = arith.truncf %214 : vector<8x128xf32> to vector<8x128xbf16>
    %216 = arith.index_cast %c4_i32 : i32 to index
    %c0_46 = arith.constant 0 : index
    %c0_47 = arith.constant 0 : index
    %217 = vector.load %arg5[%216, %c0_46, %c0_47] : memref<8x8x128xbf16, #tpu.memory_space<vmem>>, vector<1x8x128xbf16>
    %218 = vector.shape_cast %217 : vector<1x8x128xbf16> to vector<8x128xbf16>
    %219 = vector.shape_cast %215 : vector<8x128xbf16> to vector<1x8x128xbf16>
    tpu.vector_store %arg5[%216, %c0_46, %c0_47], %219 {strides = array<i32>} : memref<8x8x128xbf16, #tpu.memory_space<vmem>>, vector<1x8x128xbf16>,
    %c5_i32 = arith.constant 5 : i32
    %220 = arith.index_cast %c5_i32 : i32 to index
    %c0_48 = arith.constant 0 : index
    %c0_49 = arith.constant 0 : index
    %221 = vector.load %arg2[%220, %c0_48, %c0_49] : memref<8x8x384xbf16, #tpu.memory_space<vmem>>, vector<1x8x384xbf16>
    %222 = vector.shape_cast %221 : vector<1x8x384xbf16> to vector<8x384xbf16>
    %223 = arith.extf %222 : vector<8x384xbf16> to vector<8x384xf32>
    %224 = arith.truncf %210 : vector<8x128xf32> to vector<8x128xbf16>
    %cst_50 = arith.constant dense<0.000000e+00> : vector<8x384xf32>
    %225 = tpu.matmul %224, %4, %cst_50 {dimension_numbers = #tpu.dot_dimension_numbers<[1], [0], [0], [1], [0, 0, 1, 1], [], []>} : vector<8x128xbf16>, vector<128x384xbf16>, vector<8x384xf32> -> vector<8x384xf32>
    %226 = vector.extract_strided_slice %223 {offsets = [0, 0], sizes = [8, 256], strides = [1, 1]} : vector<8x384xf32> to vector<8x256xf32>
    %227 = vector.extract_strided_slice %225 {offsets = [0, 0], sizes = [8, 256], strides = [1, 1]} : vector<8x384xf32> to vector<8x256xf32>
    %228 = arith.addf %226, %227 : vector<8x256xf32>
    %229 = arith.negf %228 : vector<8x256xf32>
    %230 = math.exp %229 : vector<8x256xf32>
    %cst_51 = arith.constant 1.000000e+00 : f32
    %231 = vector.broadcast %cst_51 : f32 to vector<8x256xf32>
    %232 = arith.addf %231, %230 : vector<8x256xf32>
    %233 = arith.divf %231, %232 : vector<8x256xf32>
    %234 = vector.extract_strided_slice %233 {offsets = [0, 0], sizes = [8, 128], strides = [1, 1]} : vector<8x256xf32> to vector<8x128xf32>
    %235 = vector.extract_strided_slice %233 {offsets = [0, 128], sizes = [8, 128], strides = [1, 1]} : vector<8x256xf32> to vector<8x128xf32>
    %236 = vector.extract_strided_slice %223 {offsets = [0, 256], sizes = [8, 128], strides = [1, 1]} : vector<8x384xf32> to vector<8x128xf32>
    %237 = vector.extract_strided_slice %225 {offsets = [0, 256], sizes = [8, 128], strides = [1, 1]} : vector<8x384xf32> to vector<8x128xf32>
    %238 = arith.addf %237, %7 : vector<8x128xf32>
    %239 = arith.mulf %234, %238 : vector<8x128xf32>
    %240 = arith.addf %236, %239 : vector<8x128xf32>
    %241 = math.tanh %240 : vector<8x128xf32>
    %cst_52 = arith.constant 1.000000e+00 : f32
    %242 = vector.broadcast %cst_52 : f32 to vector<8x128xf32>
    %243 = arith.subf %242, %235 : vector<8x128xf32>
    %244 = arith.mulf %243, %241 : vector<8x128xf32>
    %245 = arith.mulf %235, %210 : vector<8x128xf32>
    %246 = arith.addf %244, %245 : vector<8x128xf32>
    %247 = arith.addi %8, %c5_i32 : i32
    %248 = vector.broadcast %247 : i32 to vector<8x1xi32>
    %249 = arith.cmpi slt, %248, %3 : vector<8x1xi32>
    %250 = vector.shape_cast %249 : vector<8x1xi1> to vector<8x1xi1>
    %251 = vector.broadcast %250 : vector<8x1xi1> to vector<8x128xi1>
    %252 = arith.select %251, %246, %210 : vector<8x128xi1>, vector<8x128xf32>
    %cst_53 = arith.constant 0.000000e+00 : f32
    %253 = vector.shape_cast %249 : vector<8x1xi1> to vector<8x1xi1>
    %254 = vector.broadcast %253 : vector<8x1xi1> to vector<8x128xi1>
    %255 = vector.broadcast %cst_53 : f32 to vector<8x128xf32>
    %256 = arith.select %254, %246, %255 : vector<8x128xi1>, vector<8x128xf32>
    %257 = arith.truncf %256 : vector<8x128xf32> to vector<8x128xbf16>
    %258 = arith.index_cast %c5_i32 : i32 to index
    %c0_54 = arith.constant 0 : index
    %c0_55 = arith.constant 0 : index
    %259 = vector.load %arg5[%258, %c0_54, %c0_55] : memref<8x8x128xbf16, #tpu.memory_space<vmem>>, vector<1x8x128xbf16>
    %260 = vector.shape_cast %259 : vector<1x8x128xbf16> to vector<8x128xbf16>
    %261 = vector.shape_cast %257 : vector<8x128xbf16> to vector<1x8x128xbf16>
    tpu.vector_store %arg5[%258, %c0_54, %c0_55], %261 {strides = array<i32>} : memref<8x8x128xbf16, #tpu.memory_space<vmem>>, vector<1x8x128xbf16>,
    %c6_i32 = arith.constant 6 : i32
    %262 = arith.index_cast %c6_i32 : i32 to index
    %c0_56 = arith.constant 0 : index
    %c0_57 = arith.constant 0 : index
    %263 = vector.load %arg2[%262, %c0_56, %c0_57] : memref<8x8x384xbf16, #tpu.memory_space<vmem>>, vector<1x8x384xbf16>
    %264 = vector.shape_cast %263 : vector<1x8x384xbf16> to vector<8x384xbf16>
    %265 = arith.extf %264 : vector<8x384xbf16> to vector<8x384xf32>
    %266 = arith.truncf %252 : vector<8x128xf32> to vector<8x128xbf16>
    %cst_58 = arith.constant dense<0.000000e+00> : vector<8x384xf32>
    %267 = tpu.matmul %266, %4, %cst_58 {dimension_numbers = #tpu.dot_dimension_numbers<[1], [0], [0], [1], [0, 0, 1, 1], [], []>} : vector<8x128xbf16>, vector<128x384xbf16>, vector<8x384xf32> -> vector<8x384xf32>
    %268 = vector.extract_strided_slice %265 {offsets = [0, 0], sizes = [8, 256], strides = [1, 1]} : vector<8x384xf32> to vector<8x256xf32>
    %269 = vector.extract_strided_slice %267 {offsets = [0, 0], sizes = [8, 256], strides = [1, 1]} : vector<8x384xf32> to vector<8x256xf32>
    %270 = arith.addf %268, %269 : vector<8x256xf32>
    %271 = arith.negf %270 : vector<8x256xf32>
    %272 = math.exp %271 : vector<8x256xf32>
    %cst_59 = arith.constant 1.000000e+00 : f32
    %273 = vector.broadcast %cst_59 : f32 to vector<8x256xf32>
    %274 = arith.addf %273, %272 : vector<8x256xf32>
    %275 = arith.divf %273, %274 : vector<8x256xf32>
    %276 = vector.extract_strided_slice %275 {offsets = [0, 0], sizes = [8, 128], strides = [1, 1]} : vector<8x256xf32> to vector<8x128xf32>
    %277 = vector.extract_strided_slice %275 {offsets = [0, 128], sizes = [8, 128], strides = [1, 1]} : vector<8x256xf32> to vector<8x128xf32>
    %278 = vector.extract_strided_slice %265 {offsets = [0, 256], sizes = [8, 128], strides = [1, 1]} : vector<8x384xf32> to vector<8x128xf32>
    %279 = vector.extract_strided_slice %267 {offsets = [0, 256], sizes = [8, 128], strides = [1, 1]} : vector<8x384xf32> to vector<8x128xf32>
    %280 = arith.addf %279, %7 : vector<8x128xf32>
    %281 = arith.mulf %276, %280 : vector<8x128xf32>
    %282 = arith.addf %278, %281 : vector<8x128xf32>
    %283 = math.tanh %282 : vector<8x128xf32>
    %cst_60 = arith.constant 1.000000e+00 : f32
    %284 = vector.broadcast %cst_60 : f32 to vector<8x128xf32>
    %285 = arith.subf %284, %277 : vector<8x128xf32>
    %286 = arith.mulf %285, %283 : vector<8x128xf32>
    %287 = arith.mulf %277, %252 : vector<8x128xf32>
    %288 = arith.addf %286, %287 : vector<8x128xf32>
    %289 = arith.addi %8, %c6_i32 : i32
    %290 = vector.broadcast %289 : i32 to vector<8x1xi32>
    %291 = arith.cmpi slt, %290, %3 : vector<8x1xi32>
    %292 = vector.shape_cast %291 : vector<8x1xi1> to vector<8x1xi1>
    %293 = vector.broadcast %292 : vector<8x1xi1> to vector<8x128xi1>
    %294 = arith.select %293, %288, %252 : vector<8x128xi1>, vector<8x128xf32>
    %cst_61 = arith.constant 0.000000e+00 : f32
    %295 = vector.shape_cast %291 : vector<8x1xi1> to vector<8x1xi1>
    %296 = vector.broadcast %295 : vector<8x1xi1> to vector<8x128xi1>
    %297 = vector.broadcast %cst_61 : f32 to vector<8x128xf32>
    %298 = arith.select %296, %288, %297 : vector<8x128xi1>, vector<8x128xf32>
    %299 = arith.truncf %298 : vector<8x128xf32> to vector<8x128xbf16>
    %300 = arith.index_cast %c6_i32 : i32 to index
    %c0_62 = arith.constant 0 : index
    %c0_63 = arith.constant 0 : index
    %301 = vector.load %arg5[%300, %c0_62, %c0_63] : memref<8x8x128xbf16, #tpu.memory_space<vmem>>, vector<1x8x128xbf16>
    %302 = vector.shape_cast %301 : vector<1x8x128xbf16> to vector<8x128xbf16>
    %303 = vector.shape_cast %299 : vector<8x128xbf16> to vector<1x8x128xbf16>
    tpu.vector_store %arg5[%300, %c0_62, %c0_63], %303 {strides = array<i32>} : memref<8x8x128xbf16, #tpu.memory_space<vmem>>, vector<1x8x128xbf16>,
    %c7_i32 = arith.constant 7 : i32
    %304 = arith.index_cast %c7_i32 : i32 to index
    %c0_64 = arith.constant 0 : index
    %c0_65 = arith.constant 0 : index
    %305 = vector.load %arg2[%304, %c0_64, %c0_65] : memref<8x8x384xbf16, #tpu.memory_space<vmem>>, vector<1x8x384xbf16>
    %306 = vector.shape_cast %305 : vector<1x8x384xbf16> to vector<8x384xbf16>
    %307 = arith.extf %306 : vector<8x384xbf16> to vector<8x384xf32>
    %308 = arith.truncf %294 : vector<8x128xf32> to vector<8x128xbf16>
    %cst_66 = arith.constant dense<0.000000e+00> : vector<8x384xf32>
    %309 = tpu.matmul %308, %4, %cst_66 {dimension_numbers = #tpu.dot_dimension_numbers<[1], [0], [0], [1], [0, 0, 1, 1], [], []>} : vector<8x128xbf16>, vector<128x384xbf16>, vector<8x384xf32> -> vector<8x384xf32>
    %310 = vector.extract_strided_slice %307 {offsets = [0, 0], sizes = [8, 256], strides = [1, 1]} : vector<8x384xf32> to vector<8x256xf32>
    %311 = vector.extract_strided_slice %309 {offsets = [0, 0], sizes = [8, 256], strides = [1, 1]} : vector<8x384xf32> to vector<8x256xf32>
    %312 = arith.addf %310, %311 : vector<8x256xf32>
    %313 = arith.negf %312 : vector<8x256xf32>
    %314 = math.exp %313 : vector<8x256xf32>
    %cst_67 = arith.constant 1.000000e+00 : f32
    %315 = vector.broadcast %cst_67 : f32 to vector<8x256xf32>
    %316 = arith.addf %315, %314 : vector<8x256xf32>
    %317 = arith.divf %315, %316 : vector<8x256xf32>
    %318 = vector.extract_strided_slice %317 {offsets = [0, 0], sizes = [8, 128], strides = [1, 1]} : vector<8x256xf32> to vector<8x128xf32>
    %319 = vector.extract_strided_slice %317 {offsets = [0, 128], sizes = [8, 128], strides = [1, 1]} : vector<8x256xf32> to vector<8x128xf32>
    %320 = vector.extract_strided_slice %307 {offsets = [0, 256], sizes = [8, 128], strides = [1, 1]} : vector<8x384xf32> to vector<8x128xf32>
    %321 = vector.extract_strided_slice %309 {offsets = [0, 256], sizes = [8, 128], strides = [1, 1]} : vector<8x384xf32> to vector<8x128xf32>
    %322 = arith.addf %321, %7 : vector<8x128xf32>
    %323 = arith.mulf %318, %322 : vector<8x128xf32>
    %324 = arith.addf %320, %323 : vector<8x128xf32>
    %325 = math.tanh %324 : vector<8x128xf32>
    %cst_68 = arith.constant 1.000000e+00 : f32
    %326 = vector.broadcast %cst_68 : f32 to vector<8x128xf32>
    %327 = arith.subf %326, %319 : vector<8x128xf32>
    %328 = arith.mulf %327, %325 : vector<8x128xf32>
    %329 = arith.mulf %319, %294 : vector<8x128xf32>
    %330 = arith.addf %328, %329 : vector<8x128xf32>
    %331 = arith.addi %8, %c7_i32 : i32
    %332 = vector.broadcast %331 : i32 to vector<8x1xi32>
    %333 = arith.cmpi slt, %332, %3 : vector<8x1xi32>
    %334 = vector.shape_cast %333 : vector<8x1xi1> to vector<8x1xi1>
    %335 = vector.broadcast %334 : vector<8x1xi1> to vector<8x128xi1>
    %336 = arith.select %335, %330, %294 : vector<8x128xi1>, vector<8x128xf32>
    %cst_69 = arith.constant 0.000000e+00 : f32
    %337 = vector.shape_cast %333 : vector<8x1xi1> to vector<8x1xi1>
    %338 = vector.broadcast %337 : vector<8x1xi1> to vector<8x128xi1>
    %339 = vector.broadcast %cst_69 : f32 to vector<8x128xf32>
    %340 = arith.select %338, %330, %339 : vector<8x128xi1>, vector<8x128xf32>
    %341 = arith.truncf %340 : vector<8x128xf32> to vector<8x128xbf16>
    %342 = arith.index_cast %c7_i32 : i32 to index
    %c0_70 = arith.constant 0 : index
    %c0_71 = arith.constant 0 : index
    %343 = vector.load %arg5[%342, %c0_70, %c0_71] : memref<8x8x128xbf16, #tpu.memory_space<vmem>>, vector<1x8x128xbf16>
    %344 = vector.shape_cast %343 : vector<1x8x128xbf16> to vector<8x128xbf16>
    %345 = vector.shape_cast %341 : vector<8x128xbf16> to vector<1x8x128xbf16>
    tpu.vector_store %arg5[%342, %c0_70, %c0_71], %345 {strides = array<i32>} : memref<8x8x128xbf16, #tpu.memory_space<vmem>>, vector<1x8x128xbf16>,
    %c8_i32_72 = arith.constant 8 : i32
    %c0_73 = arith.constant 0 : index
    %c0_74 = arith.constant 0 : index
    %346 = vector.load %arg7[%c0_73, %c0_74] : memref<8x128xf32, #tpu.memory_space<vmem>>, vector<8x128xf32>
    tpu.vector_store %arg7[%c0_73, %c0_74], %336 {strides = array<i32>} : memref<8x128xf32, #tpu.memory_space<vmem>>, vector<8x128xf32>,
    %c0_i32_75 = arith.constant 0 : i32
    %347 = arith.cmpi eq, %arg0, %c0_i32_75 : i32
    %348 = arith.extui %347 : i1 to i32
    %c0_i32_76 = arith.constant 0 : i32
    %349 = arith.cmpi ne, %348, %c0_i32_76 : i32
    scf.if %349 {
      %c0_77 = arith.constant 0 : index
      %c0_78 = arith.constant 0 : index
      %350 = vector.load %arg6[%c0_77, %c0_78] : memref<8x128xf32, #tpu.memory_space<vmem>>, vector<8x128xf32>
      tpu.vector_store %arg6[%c0_77, %c0_78], %336 {strides = array<i32>} : memref<8x128xf32, #tpu.memory_space<vmem>>, vector<8x128xf32>,
    } else {
    }
    return
  }
  func.func @transform_0(%arg0: i32) -> (i32, i32) {
    %c0_i32 = arith.constant 0 : i32
    %c0_i32_0 = arith.constant 0 : i32
    %c0_i32_1 = arith.constant 0 : i32
    return %c0_i32, %c0_i32_0 : i32, i32
  }
  func.func @transform_1(%arg0: i32) -> (i32, i32, i32) {
    %c0_i32 = arith.constant 0 : i32
    %c0_i32_0 = arith.constant 0 : i32
    %c0_i32_1 = arith.constant 0 : i32
    return %arg0, %c0_i32, %c0_i32_0 : i32, i32, i32
  }
  func.func @transform_2(%arg0: i32) -> (i32, i32) {
    %c0_i32 = arith.constant 0 : i32
    %c0_i32_0 = arith.constant 0 : i32
    %c0_i32_1 = arith.constant 0 : i32
    return %c0_i32, %c0_i32_0 : i32, i32
  }
  func.func @transform_3(%arg0: i32) -> (i32, i32) {
    %c0_i32 = arith.constant 0 : i32
    %c0_i32_0 = arith.constant 0 : i32
    %c0_i32_1 = arith.constant 0 : i32
    return %c0_i32, %c0_i32_0 : i32, i32
  }
  func.func @transform_4(%arg0: i32) -> (i32, i32, i32) {
    %c0_i32 = arith.constant 0 : i32
    %c0_i32_0 = arith.constant 0 : i32
    %c0_i32_1 = arith.constant 0 : i32
    return %arg0, %c0_i32, %c0_i32_0 : i32, i32, i32
  }
  func.func @transform_5(%arg0: i32) -> (i32, i32) {
    %c0_i32 = arith.constant 0 : i32
    %c0_i32_0 = arith.constant 0 : i32
    %c0_i32_1 = arith.constant 0 : i32
    return %c0_i32, %c0_i32_0 : i32, i32
  }
}

module attributes {stable_mosaic.version = 11 : i64} {
  func.func @_linear_kernel(%arg0: i32, %arg1: i32, %arg2: memref<64x128xbf16, #tpu.memory_space<vmem>>, %arg3: memref<128x128xbf16, #tpu.memory_space<vmem>>, %arg4: memref<1x128xf32, #tpu.memory_space<vmem>>, %arg5: memref<64x128xbf16, #tpu.memory_space<vmem>>) attributes {dimension_semantics = [#tpu.dimension_semantics<parallel>, #tpu.dimension_semantics<parallel>], iteration_bounds = array<i64: 1, 3>, scalar_prefetch = 0 : i64, scratch_operands = 0 : i64, tpu.core_type = #tpu.core_type<tc>, window_params = [{transform_indices = @transform_0, window_bounds = array<i64: 64, 128>}, {transform_indices = @transform_1, window_bounds = array<i64: 128, 128>}, {transform_indices = @transform_2, window_bounds = array<i64: 1, 128>}, {transform_indices = @transform_3, window_bounds = array<i64: 64, 128>}]} {
    %c0 = arith.constant 0 : index
    %c0_0 = arith.constant 0 : index
    %0 = vector.load %arg2[%c0, %c0_0] : memref<64x128xbf16, #tpu.memory_space<vmem>>, vector<64x128xbf16>
    %c0_1 = arith.constant 0 : index
    %c0_2 = arith.constant 0 : index
    %1 = vector.load %arg3[%c0_1, %c0_2] : memref<128x128xbf16, #tpu.memory_space<vmem>>, vector<128x128xbf16>
    %cst = arith.constant dense<0.000000e+00> : vector<64x128xf32>
    %2 = tpu.matmul %0, %1, %cst {dimension_numbers = #tpu.dot_dimension_numbers<[1], [0], [0], [1], [0, 0, 1, 1], [], []>} : vector<64x128xbf16>, vector<128x128xbf16>, vector<64x128xf32> -> vector<64x128xf32>
    %c0_3 = arith.constant 0 : index
    %c0_4 = arith.constant 0 : index
    %3 = vector.load %arg4[%c0_3, %c0_4] : memref<1x128xf32, #tpu.memory_space<vmem>>, vector<1x128xf32>
    %4 = vector.broadcast %3 : vector<1x128xf32> to vector<64x128xf32>
    %5 = arith.addf %2, %4 : vector<64x128xf32>
    %6 = arith.truncf %5 : vector<64x128xf32> to vector<64x128xbf16>
    %c0_5 = arith.constant 0 : index
    %c0_6 = arith.constant 0 : index
    %7 = vector.load %arg5[%c0_5, %c0_6] : memref<64x128xbf16, #tpu.memory_space<vmem>>, vector<64x128xbf16>
    tpu.vector_store %arg5[%c0_5, %c0_6], %6 {strides = array<i32>} : memref<64x128xbf16, #tpu.memory_space<vmem>>, vector<64x128xbf16>,
    return
  }
  func.func @transform_0(%arg0: i32, %arg1: i32) -> (i32, i32) {
    %c0_i32 = arith.constant 0 : i32
    %c0_i32_0 = arith.constant 0 : i32
    return %arg0, %c0_i32 : i32, i32
  }
  func.func @transform_1(%arg0: i32, %arg1: i32) -> (i32, i32) {
    %c0_i32 = arith.constant 0 : i32
    %c0_i32_0 = arith.constant 0 : i32
    return %c0_i32, %arg1 : i32, i32
  }
  func.func @transform_2(%arg0: i32, %arg1: i32) -> (i32, i32) {
    %c0_i32 = arith.constant 0 : i32
    %c0_i32_0 = arith.constant 0 : i32
    return %c0_i32, %arg1 : i32, i32
  }
  func.func @transform_3(%arg0: i32, %arg1: i32) -> (i32, i32) {
    %c0_i32 = arith.constant 0 : i32
    return %arg0, %arg1 : i32, i32
  }
}

module attributes {stable_mosaic.version = 11 : i64} {
  func.func @_linear_kernel(%arg0: i32, %arg1: i32, %arg2: memref<64x128xbf16, #tpu.memory_space<vmem>>, %arg3: memref<128x128xbf16, #tpu.memory_space<vmem>>, %arg4: memref<1x128xf32, #tpu.memory_space<vmem>>, %arg5: memref<64x128xf32, #tpu.memory_space<vmem>>) attributes {dimension_semantics = [#tpu.dimension_semantics<parallel>, #tpu.dimension_semantics<parallel>], iteration_bounds = array<i64: 1, 1>, scalar_prefetch = 0 : i64, scratch_operands = 0 : i64, tpu.core_type = #tpu.core_type<tc>, window_params = [{transform_indices = @transform_0, window_bounds = array<i64: 64, 128>}, {transform_indices = @transform_1, window_bounds = array<i64: 128, 128>}, {transform_indices = @transform_2, window_bounds = array<i64: 1, 128>}, {transform_indices = @transform_3, window_bounds = array<i64: 64, 128>}]} {
    %c0 = arith.constant 0 : index
    %c0_0 = arith.constant 0 : index
    %0 = vector.load %arg2[%c0, %c0_0] : memref<64x128xbf16, #tpu.memory_space<vmem>>, vector<64x128xbf16>
    %c0_1 = arith.constant 0 : index
    %c0_2 = arith.constant 0 : index
    %1 = vector.load %arg3[%c0_1, %c0_2] : memref<128x128xbf16, #tpu.memory_space<vmem>>, vector<128x128xbf16>
    %cst = arith.constant dense<0.000000e+00> : vector<64x128xf32>
    %2 = tpu.matmul %0, %1, %cst {dimension_numbers = #tpu.dot_dimension_numbers<[1], [0], [0], [1], [0, 0, 1, 1], [], []>} : vector<64x128xbf16>, vector<128x128xbf16>, vector<64x128xf32> -> vector<64x128xf32>
    %c0_3 = arith.constant 0 : index
    %c0_4 = arith.constant 0 : index
    %3 = vector.load %arg4[%c0_3, %c0_4] : memref<1x128xf32, #tpu.memory_space<vmem>>, vector<1x128xf32>
    %4 = vector.broadcast %3 : vector<1x128xf32> to vector<64x128xf32>
    %5 = arith.addf %2, %4 : vector<64x128xf32>
    %c0_5 = arith.constant 0 : index
    %c0_6 = arith.constant 0 : index
    %6 = vector.load %arg5[%c0_5, %c0_6] : memref<64x128xf32, #tpu.memory_space<vmem>>, vector<64x128xf32>
    tpu.vector_store %arg5[%c0_5, %c0_6], %5 {strides = array<i32>} : memref<64x128xf32, #tpu.memory_space<vmem>>, vector<64x128xf32>,
    return
  }
  func.func @transform_0(%arg0: i32, %arg1: i32) -> (i32, i32) {
    %c0_i32 = arith.constant 0 : i32
    %c0_i32_0 = arith.constant 0 : i32
    return %arg0, %c0_i32 : i32, i32
  }
  func.func @transform_1(%arg0: i32, %arg1: i32) -> (i32, i32) {
    %c0_i32 = arith.constant 0 : i32
    %c0_i32_0 = arith.constant 0 : i32
    return %c0_i32, %arg1 : i32, i32
  }
  func.func @transform_2(%arg0: i32, %arg1: i32) -> (i32, i32) {
    %c0_i32 = arith.constant 0 : i32
    %c0_i32_0 = arith.constant 0 : i32
    return %c0_i32, %arg1 : i32, i32
  }
  func.func @transform_3(%arg0: i32, %arg1: i32) -> (i32, i32) {
    %c0_i32 = arith.constant 0 : i32
    return %arg0, %arg1 : i32, i32
  }
}

</mosaic_0001>

<bundles_post_ra>
// kernel: _lambda_.5
= control target key start
LH: loop header
LB: loop body
LE: loop exit
PB: predicated region body
PF: predicated region fallthrough
CT: control target
= control target key end

     0   :  { %8 = vsyncpa [#allocation3], 0  ;;  %s977_s0 = inlined_call_operand.vmem [shape: bf16[64,128], index: 0, kind: input, shape index: {}]   ;;  %s978_s1 = inlined_call_operand.hbm [shape: bf16[128,384], index: 1, kind: input, shape index: {}]   ;;  %s979_s2 = inlined_call_operand.vmem [shape: f32[1,384], index: 2, kind: input, shape index: {}]   ;;  %s980_s3 = inlined_call_operand.vmem [shape: bf16[64,384], index: 3, kind: output, shape index: {}]  }
   0x1   :  { %10 = vsyncpa [#allocation3 + $0x1], 0  ;;  %s844_s12 = smov 0   ;;  %s846_s13 = smov 0  }
   0x2   :  { %s848_s14 = smov 0   ;;  %s850_s15 = smov 0  }
   0x3   :  { %s852_s16 = smov 0   ;;  %s854_s17 = smov 0  }
   0x4 LB: > { %s559_s18 = sadd.s32 4294967295, %s819_s17   ;;  %s25_s19 = sadd.s32 1, %s815_s16  ;;  %s819_s17 = sphi %s854_s17, %s16_s17   ;;  %s815_s16 = sphi %s852_s16, %s988_s16   ;;  %s811_s15 = sphi %s850_s15, %s987_s15   ;;  %s807_s14 = sphi %s848_s14, %s986_s14   ;;  %s803_s13 = sphi %s846_s13, %s985_s13   ;;  %s799_s12 = sphi %s844_s12, %s984_s12  }
   0x5   : > { %p26_p0 = scmp.ge.s32.totalorder %s25_s19, 3  ;;  %s61_s20 = sadd.s32 1, %s807_s14 }
   0x6   : > { %p68_p1 = scmp.ne.s32.totalorder %s807_s14, %s803_s13  ;;  %p69_p2 = scmp.eq.s32.totalorder %s819_s17, 0 }
   0x7   : > { %s990_s19 = smov (%p26_p0, %s25_s19), 0  ;;  %p74_p4 = scmp.ne.s32.totalorder %s803_s13, %s799_s12 }
   0x8   : > { %p880_p3 = por %p69_p2, %p68_p1  ;;  %s58_s22 = ssub.s32 %s815_s16, %s990_s19 }
   0x9   : > { %p75_p5 = scmp.eq.s32.totalorder %s559_s18, 0  ;;  %p59_p6 = scmp.eq.s32.totalorder %s58_s22, 0 }
   0xa   : > { %p126_p7 = scmp.eq.s32.totalorder %s559_s18, 2  ;;  %p686_p10 = scmp.lt.s32.totalorder %s819_s17, 3 }
   0xb   : > { %p887_p8 = por %p75_p5, %p74_p4  ;;  %s161_s26 = sand.u32 1, %s807_s14  }
   0xc   : > { %s892_s24 = scalar_select %p59_p6, %s807_s14, %s61_s20  }
   0xd   : > { %p894_p9 = por %p126_p7, %p68_p1  ;;  %s565_s27 = sshll.u32 %s815_s16, 2 }
   0xe   : > { %s564_s28 = sshll.u32 %s161_s26, 6  ;;  %s169_s4 = scalar_lea.hbm %s978_s1, %s565_s27 }
   0xf   : > { %s170_s5 = sshll.u32 %s169_s4, 4  ;;  %s165_s6 = scalar_lea.vmem [#allocation2], %s564_s28  ;;  %s171_s5 = int_to_ptr.hbm [resolvable:$true] %s170_s5 }
  0x10   : > { %s172_s7 = sshll.u32 %s165_s6, 4  ;;  %p683_p11 = pnand %p686_p10, %p880_p3  ;;  %s173_s7 = int_to_ptr.vmem [resolvable:$true] %s172_s7 }
  0x11   : > { %p566_p12 = scmp.ge.s32.totalorder %s819_s17, 1  ;;  %s162_s8 = scalar_lea.sflag [#allocation3], %s161_s26 }
  0x12   : > { %s821_s9 = smov 192   ;;  %s822_s10 = smov 64  }
  0x13   : > { %s823_s11 = smov 4   ;;  %p186_p13 = scmp.lt.s32.totalorder %s819_s17, 4 }
  0x14   : > { %685 = dma.hbm_to_vmem [thread:$0]  (!%p683_p11), %s171_s5, 1024, %s173_s7, %s162_s8, %s821_s9, %s822_s10, %s823_s11  }
  0x15   : > { %p187_p0 = pnand %p566_p12, %p186_p13 }
  0x16   : > { %s909_s12 = sand.u32 (!%p187_p0), 1, %s803_s13  }
  0x17   : > { %190 = sbr.rel (%p187_p0) target bundleno = 218 (0xda), region = 32  ;;  %s567_s18 = sshll.u32 (!%p187_p0), %s909_s12, 6 }
  0x18   : > { %s193_s20 = scalar_lea.sflag (!%p187_p0), [#allocation3], %s909_s12  ;;  %s913_s22 = scalar_lea.vmem (!%p187_p0), [#allocation2], %s567_s18 }
  0x1c   : > { %794 = dma.done.wait (%p887_p8), %s193_s20, 1024  }
  0x1d   : > { %796 = vsyncadd (%p887_p8), %s193_s20, 4294966272  ;;  %p233_p1 = scmp.lt.s32.totalorder %s811_s15, 2  ;;  %v632_v0 = vld [vmem:[%s913_s22 + $0x38] sm:$0xff]  ;;  %v631_v1 = vld [vmem:[%s913_s22 + $0x30] sm:$0xff]  ;;  %s568_s11 = sshll.u32 %s909_s12, 5 }
  0x1e   : > { %337 = vmatpush.bf16.msra.mxu0 %v632_v0  ;;  %656 = vmatpush.bf16.msra.mxu1 %v632_v0  ;;  %v630_v2 = vld [vmem:[%s913_s22 + $0x28] sm:$0xff]  ;;  %v629_v3 = vld [vmem:[%s913_s22 + $0x20] sm:$0xff]  ;;  %v628_v4 = vld [vmem:[%s913_s22 + $0x18] sm:$0xff]  ;;  %s226_s18 = scalar_lea.vmem [#allocation4], %s568_s11  ;;  %s618_s12 = sshll.u32 (%p894_p9), %s811_s15, 2 }
  0x1f   : > { %s921_s21 = scalar_select %p233_p1, %s811_s15, 2  ;;  %657 = vmatpush.bf16.msra.mxu2 %v632_v0  ;;  %658 = vmatpush.bf16.msra.mxu3 %v632_v0  ;;  %v627_v5 = vld [vmem:[%s913_s22 + $0x10] sm:$0xff]  ;;  %v626_v6 = vld [vmem:[%s913_s22 + $0x8] sm:$0xff]  ;;  %v625_v7 = vld [vmem:[%s913_s22] sm:$0xff] }
  0x20   : > { %v621_v8 = vld [vmem:[%s977_s0] sm:$0xff]  ;;  %v622_v9 = vld [vmem:[%s977_s0 + $0x8] sm:$0xff]  ;;  %v623_v10 = vld [vmem:[%s977_s0 + $0x10] sm:$0xff] }
  0x21   : > { %s235_s27 = scalar_lea.vmem %s979_s2, %s921_s21  ;;  %v624_v11 = vld [vmem:[%s977_s0 + $0x18] sm:$0xff]  ;;  %s393_s21 = scalar_lea.vmem (%p894_p9), %s980_s3, %s618_s12 }
  0x22   : > { %338 = vmatpush.bf16.msra.mxu0 %v631_v1  ;;  %659 = vmatpush.bf16.msra.mxu1 %v631_v1  ;;  %v738_v14 = vld [vmem:[%s235_s27] ss:$0 sm:$0xff] }
  0x23   : > { %660 = vmatpush.bf16.msra.mxu2 %v631_v1  ;;  %661 = vmatpush.bf16.msra.mxu3 %v631_v1 }
  0x26   : > { %339 = vmatpush.bf16.msra.mxu0 %v630_v2  ;;  %662 = vmatpush.bf16.msra.mxu1 %v630_v2 }
  0x27   : > { %663 = vmatpush.bf16.msra.mxu2 %v630_v2  ;;  %664 = vmatpush.bf16.msra.mxu3 %v630_v2 }
  0x2a   : > { %340 = vmatpush.bf16.msra.mxu0 %v629_v3  ;;  %665 = vmatpush.bf16.msra.mxu1 %v629_v3 }
  0x2b   : > { %666 = vmatpush.bf16.msra.mxu2 %v629_v3  ;;  %667 = vmatpush.bf16.msra.mxu3 %v629_v3 }
  0x2e   : > { %341 = vmatpush.bf16.msra.mxu0 %v628_v4  ;;  %668 = vmatpush.bf16.msra.mxu1 %v628_v4 }
  0x2f   : > { %669 = vmatpush.bf16.msra.mxu2 %v628_v4  ;;  %670 = vmatpush.bf16.msra.mxu3 %v628_v4 }
  0x32   : > { %342 = vmatpush.bf16.msra.mxu0 %v627_v5  ;;  %671 = vmatpush.bf16.msra.mxu1 %v627_v5 }
  0x33   : > { %672 = vmatpush.bf16.msra.mxu2 %v627_v5  ;;  %673 = vmatpush.bf16.msra.mxu3 %v627_v5 }
  0x36   : > { %343 = vmatpush.bf16.msra.mxu0 %v626_v6  ;;  %674 = vmatpush.bf16.msra.mxu1 %v626_v6 }
  0x37   : > { %675 = vmatpush.bf16.msra.mxu2 %v626_v6  ;;  %676 = vmatpush.bf16.msra.mxu3 %v626_v6 }
  0x3a   : > { %344 = vmatpush.bf16.msra.mxu0 %v625_v7  ;;  %677 = vmatpush.bf16.msra.mxu1 %v625_v7 }
  0x3b   : > { %678 = vmatpush.bf16.msra.mxu2 %v625_v7  ;;  %679 = vmatpush.bf16.msra.mxu3 %v625_v7 }
  0x3d   : > { %345 = vmatmul.bf16.vlgmr.msra.gmra.mxu0 %v621_v8  ;;  %350 = vmatmul.bf16.vlgmr.msra.gmra.mxu1 %v622_v9 }
  0x3e   : > { %355 = vmatmul.bf16.vlgmr.msra.gmra.mxu2 %v623_v10  ;;  %360 = vmatmul.bf16.vlgmr.msra.gmra.mxu3 %v624_v11 }
  0xba   : > { %v346_v12 = vpop.f32.mrf.mxu0  ;;  %v351_v13 = vpop.f32.mrf.mxu1 }
  0xbb   : > { %v347_v19 = vadd.f32 %v738_v14, %v346_v12  ;;  %v352_v20 = vadd.f32 %v738_v14, %v351_v13 }
  0xc1   : > { %v356_v15 = vpop.f32.mrf.mxu2  ;;  %v361_v16 = vpop.f32.mrf.mxu3 }
  0xc2   : > { %v348_v17 = vpop.f32.mrf.mxu0  ;;  %v353_v18 = vpop.f32.mrf.mxu1  ;;  %v357_v27 = vadd.f32 %v738_v14, %v356_v15  ;;  %v362_v28 = vadd.f32 %v738_v14, %v361_v16 }
  0xc3   : > { %v349_v21 = vadd.f32 %v738_v14, %v348_v17  ;;  %v354_v22 = vadd.f32 %v738_v14, %v353_v18 }
  0xc5   : > { %v636_v23 = vpack.c.bf16 %v349_v21, %v347_v19  ;;  %v641_v24 = vpack.c.bf16 %v354_v22, %v352_v20 }
  0xc7   : > { %637 = vst [vmem:[%s226_s18] sm:$0xff] %v636_v23  }
  0xc8   : > { %653 = vst [vmem:[%s226_s18 + $0x8] sm:$0xff] %v641_v24  }
  0xc9   : > { %v358_v25 = vpop.f32.mrf.mxu2  ;;  %v363_v26 = vpop.f32.mrf.mxu3 }
  0xca   : > { %v359_v29 = vadd.f32 %v738_v14, %v358_v25  ;;  %v364_v30 = vadd.f32 %v738_v14, %v363_v26 }
  0xcb   : > { %388 = sbr.rel (!%p894_p9) target bundleno = 218 (0xda), region = 40 }
  0xcc   : > { %v646_v31 = vpack.c.bf16 %v359_v29, %v357_v27  ;;  %v651_v32 = vpack.c.bf16 %v364_v30, %v362_v28 }
  0xce   : > { %654 = vst [vmem:[%s226_s18 + $0x10] sm:$0xff] %v646_v31   ;;  %v410_v33 = vld [vmem:[%s226_s18] sm:$0xf] (%p894_p9)  ;;  %v412_v34 = vld [vmem:[%s226_s18 + $0x4] sm:$0xf] (%p894_p9) }
  0xcf   : > { %655 = vst [vmem:[%s226_s18 + $0x18] sm:$0xff] %v651_v32   ;;  %v414_v35 = vld [vmem:[%s226_s18 + $0x8] sm:$0xf] (%p894_p9)  ;;  %v416_v36 = vld [vmem:[%s226_s18 + $0xc] sm:$0xf] (%p894_p9) }
  0xd0   : > { %411 = vst [vmem:[%s393_s21] sm:$0xf] %v410_v33 }
  0xd1   : > { %413 = vst [vmem:[%s393_s21 + $0xc] sm:$0xf] %v412_v34 }
  0xd2   : > { %415 = vst [vmem:[%s393_s21 + $0x18] sm:$0xf] %v414_v35 }
  0xd3   : > { %417 = vst [vmem:[%s393_s21 + $0x24] sm:$0xf] %v416_v36 }
  0xd5   : > { %v418_v37 = vld [vmem:[%s226_s18 + $0x10] sm:$0xf]  ;;  %v420_v38 = vld [vmem:[%s226_s18 + $0x14] sm:$0xf] }
  0xd6   : > { %v422_v39 = vld [vmem:[%s226_s18 + $0x18] sm:$0xf]  ;;  %419 = vst [vmem:[%s393_s21 + $0x30] sm:$0xf] %v418_v37  ;;  %v424_v40 = vld [vmem:[%s226_s18 + $0x1c] sm:$0xf] }
  0xd7   : > { %421 = vst [vmem:[%s393_s21 + $0x3c] sm:$0xf] %v420_v38 }
  0xd8   : > { %423 = vst [vmem:[%s393_s21 + $0x48] sm:$0xf] %v422_v39 }
  0xd9   : > { %425 = vst [vmem:[%s393_s21 + $0x54] sm:$0xf] %v424_v40 }
  0xda PF: > { %s16_s17 = sadd.s32 1, %s819_s17   ;;  %s984_s12 = smov %s803_s13 }
  0xdb   : > { %p13_p2 = scmp.ge.s32.totalorder %s16_s17, 5   ;;  %s985_s13 = smov %s807_s14 }
  0xdc   : > { %s986_s14 = smov %s892_s24  ;;  %s987_s15 = smov %s815_s16 }
  0xdd   : > { %s988_s16 = smov %s990_s19  ;;  %15 = sbr.rel (!%p13_p2) target bundleno = 4 (0x4), region = 119 }
  0xe2   :  { %475 = vsyncpa [#allocation3], 1 }
  0xe3   :  { %477 = vsyncpa [#allocation3 + $0x1], 1 }

// kernel: _lambda_.9
= control target key start
LH: loop header
LB: loop body
LE: loop exit
PB: predicated region body
PF: predicated region fallthrough
CT: control target
= control target key end

     0   :  { %s323_s1 = inlined_call_operand.vmem [shape: bf16[128,128], index: 1, kind: input, shape index: {}]   ;;  %s324_s2 = inlined_call_operand.vmem [shape: f32[1,128], index: 2, kind: input, shape index: {}]   ;;  %s325_s0 = inlined_call_operand.vmem [shape: bf16[64,128], index: 0, kind: input, shape index: {}]   ;;  %s326_s3 = inlined_call_operand.vmem [shape: f32[64,128], index: 3, kind: output, shape index: {}]  }
   0x1   :  { %v214_v0 = vld [vmem:[%s323_s1 + $0x38] sm:$0xff]  ;;  %v213_v1 = vld [vmem:[%s323_s1 + $0x30] sm:$0xff]  ;;  %v212_v2 = vld [vmem:[%s323_s1 + $0x28] sm:$0xff] }
   0x2   :  { %114 = vmatpush.bf16.msra.mxu0 %v214_v0  ;;  %215 = vmatpush.bf16.msra.mxu1 %v214_v0  ;;  %v211_v3 = vld [vmem:[%s323_s1 + $0x20] sm:$0xff]  ;;  %v210_v4 = vld [vmem:[%s323_s1 + $0x18] sm:$0xff]  ;;  %v209_v5 = vld [vmem:[%s323_s1 + $0x10] sm:$0xff] }
   0x3   :  { %216 = vmatpush.bf16.msra.mxu2 %v214_v0  ;;  %217 = vmatpush.bf16.msra.mxu3 %v214_v0  ;;  %v208_v6 = vld [vmem:[%s323_s1 + $0x8] sm:$0xff]  ;;  %v207_v7 = vld [vmem:[%s323_s1] sm:$0xff]  ;;  %v205_v10 = vld [vmem:[%s325_s0 + $0x10] sm:$0xff] }
   0x4   :  { %v203_v8 = vld [vmem:[%s325_s0] sm:$0xff]  ;;  %v204_v9 = vld [vmem:[%s325_s0 + $0x8] sm:$0xff]  ;;  %v206_v11 = vld [vmem:[%s325_s0 + $0x18] sm:$0xff] }
   0x5   :  { %v239_v12 = vld [vmem:[%s324_s2] ss:$0 sm:$0xff] }
   0x6   :  { %115 = vmatpush.bf16.msra.mxu0 %v213_v1  ;;  %218 = vmatpush.bf16.msra.mxu1 %v213_v1 }
   0x7   :  { %219 = vmatpush.bf16.msra.mxu2 %v213_v1  ;;  %220 = vmatpush.bf16.msra.mxu3 %v213_v1 }
   0xa   :  { %116 = vmatpush.bf16.msra.mxu0 %v212_v2  ;;  %221 = vmatpush.bf16.msra.mxu1 %v212_v2 }
   0xb   :  { %222 = vmatpush.bf16.msra.mxu2 %v212_v2  ;;  %223 = vmatpush.bf16.msra.mxu3 %v212_v2 }
   0xe   :  { %117 = vmatpush.bf16.msra.mxu0 %v211_v3  ;;  %224 = vmatpush.bf16.msra.mxu1 %v211_v3 }
   0xf   :  { %225 = vmatpush.bf16.msra.mxu2 %v211_v3  ;;  %226 = vmatpush.bf16.msra.mxu3 %v211_v3 }
  0x12   :  { %118 = vmatpush.bf16.msra.mxu0 %v210_v4  ;;  %227 = vmatpush.bf16.msra.mxu1 %v210_v4 }
  0x13   :  { %228 = vmatpush.bf16.msra.mxu2 %v210_v4  ;;  %229 = vmatpush.bf16.msra.mxu3 %v210_v4 }
  0x16   :  { %119 = vmatpush.bf16.msra.mxu0 %v209_v5  ;;  %230 = vmatpush.bf16.msra.mxu1 %v209_v5 }
  0x17   :  { %231 = vmatpush.bf16.msra.mxu2 %v209_v5  ;;  %232 = vmatpush.bf16.msra.mxu3 %v209_v5 }
  0x1a   :  { %120 = vmatpush.bf16.msra.mxu0 %v208_v6  ;;  %233 = vmatpush.bf16.msra.mxu1 %v208_v6 }
  0x1b   :  { %234 = vmatpush.bf16.msra.mxu2 %v208_v6  ;;  %235 = vmatpush.bf16.msra.mxu3 %v208_v6 }
  0x1e   :  { %121 = vmatpush.bf16.msra.mxu0 %v207_v7  ;;  %236 = vmatpush.bf16.msra.mxu1 %v207_v7 }
  0x1f   :  { %237 = vmatpush.bf16.msra.mxu2 %v207_v7  ;;  %238 = vmatpush.bf16.msra.mxu3 %v207_v7 }
  0x21   :  { %122 = vmatmul.bf16.vlgmr.msra.gmra.mxu0 %v203_v8  ;;  %127 = vmatmul.bf16.vlgmr.msra.gmra.mxu1 %v204_v9 }
  0x22   :  { %132 = vmatmul.bf16.vlgmr.msra.gmra.mxu2 %v205_v10  ;;  %137 = vmatmul.bf16.vlgmr.msra.gmra.mxu3 %v206_v11 }
  0x9e   :  { %v123_v13 = vpop.f32.mrf.mxu0  ;;  %v128_v14 = vpop.f32.mrf.mxu1 }
  0x9f   :  { %v124_v15 = vadd.f32 %v239_v12, %v123_v13  ;;  %v129_v16 = vadd.f32 %v239_v12, %v128_v14 }
  0xa1   :  { %143 = vst [vmem:[%s326_s3] sm:$0xff] %v124_v15 }
  0xa2   :  { %145 = vst [vmem:[%s326_s3 + $0x10] sm:$0xff] %v129_v16 }
  0xa5   :  { %v133_v17 = vpop.f32.mrf.mxu2  ;;  %v138_v18 = vpop.f32.mrf.mxu3 }
  0xa6   :  { %v134_v19 = vadd.f32 %v239_v12, %v133_v17  ;;  %v139_v20 = vadd.f32 %v239_v12, %v138_v18  ;;  %v125_v21 = vpop.f32.mrf.mxu0  ;;  %v130_v22 = vpop.f32.mrf.mxu1 }
  0xa7   :  { %v126_v23 = vadd.f32 %v239_v12, %v125_v21  ;;  %v131_v24 = vadd.f32 %v239_v12, %v130_v22 }
  0xa8   :  { %147 = vst [vmem:[%s326_s3 + $0x20] sm:$0xff] %v134_v19 }
  0xa9   :  { %149 = vst [vmem:[%s326_s3 + $0x30] sm:$0xff] %v139_v20 }
  0xaa   :  { %144 = vst [vmem:[%s326_s3 + $0x8] sm:$0xff] %v126_v23 }
  0xab   :  { %146 = vst [vmem:[%s326_s3 + $0x18] sm:$0xff] %v131_v24 }
  0xad   :  { %v135_v25 = vpop.f32.mrf.mxu2  ;;  %v140_v26 = vpop.f32.mrf.mxu3 }
  0xae   :  { %v136_v27 = vadd.f32 %v239_v12, %v135_v25  ;;  %v141_v28 = vadd.f32 %v239_v12, %v140_v26 }
  0xb0   :  { %148 = vst [vmem:[%s326_s3 + $0x28] sm:$0xff] %v136_v27 }
  0xb1   :  { %150 = vst [vmem:[%s326_s3 + $0x38] sm:$0xff] %v141_v28 }

// kernel: _lambda_.6
= control target key start
LH: loop header
LB: loop body
LE: loop exit
PB: predicated region body
PF: predicated region fallthrough
CT: control target
= control target key end

     0   :  { %11 = vsyncpa [#allocation4], 0  ;;  %s1364_s21 = smov [#allocation3]   ;;  %s1365_s23 = smov 192   ;;  %s1801_s0 = inlined_call_operand.vmem [shape: s32[8,1], index: 0, kind: input, shape index: {}]   ;;  %s1802_s1 = inlined_call_operand.vmem [shape: bf16[8,8,384], index: 1, kind: input, shape index: {}]   ;;  %s1803_s2 = inlined_call_operand.hbm [shape: bf16[128,384], index: 2, kind: input, shape index: {}]   ;;  %s1804_s3 = inlined_call_operand.vmem [shape: f32[1,128], index: 3, kind: input, shape index: {}]   ;;  %s1805_s4 = inlined_call_operand.vmem [shape: bf16[8,8,128], index: 4, kind: output, shape index: {0}]   ;;  %s1806_s5 = inlined_call_operand.vmem [shape: f32[8,128], index: 5, kind: output, shape index: {1}]  }
   0x1   :  { %s20_s20 = sshll.u32 %s1803_s2, 4  ;;  %s22_s22 = sshll.u32 %s1364_s21, 4  ;;  %s21_s20 = int_to_ptr.hbm [resolvable:$true] %s20_s20  ;;  %s23_s22 = int_to_ptr.vmem [resolvable:$true] %s22_s22 }
   0x2   :  { %s1366_s24 = smov 12  }
   0x3   :  { %28 = dma.hbm_to_vmem [thread:$0]  %s21_s20, 3072, %s23_s22, [#allocation4], %s1365_s23, %s1365_s23, %s1366_s24  }
   0x4   :  { %1362 = dma.done.wait [#allocation4], 3072  }
   0x5   :  { %1363 = vsyncadd [#allocation4], 4294964224  ;;  %v1160_v0 = vld [vmem:[#allocation3 + $0xa8] sm:$0xf]  ;;  %v1237_v1 = vld [vmem:[#allocation3 + $0xb0] sm:$0xf0] }
   0x6   :  { %v1236_v2 = vld [vmem:[#allocation3 + $0xac] sm:$0xf]  ;;  %v1402_v3 = vor.u32 %v1237_v1, %v1160_v0  ;;  %v1162_v4 = vld [vmem:[#allocation3 + $0xb4] sm:$0xf0]  ;;  %v1148_v5 = vld [vmem:[#allocation3 + $0x90] sm:$0xf] }
   0x7   :  { %v1234_v6 = vld [vmem:[#allocation3 + $0x98] sm:$0xf0]  ;;  %v1404_v7 = vor.u32 %v1236_v2, %v1162_v4  ;;  %v1233_v8 = vld [vmem:[#allocation3 + $0x94] sm:$0xf]  ;;  %v1150_v9 = vld [vmem:[#allocation3 + $0x9c] sm:$0xf0] }
   0x8   :  { %213 = vmatpush.bf16.msra.mxu0 %v1402_v3  ;;  %v1407_v10 = vor.u32 %v1234_v6, %v1148_v5  ;;  %318 = vmatpush.bf16.msra.mxu3 %v1402_v3  ;;  %v1411_v11 = vor.u32 %v1233_v8, %v1150_v9  ;;  %v1136_v12 = vld [vmem:[#allocation3 + $0x78] sm:$0xf]  ;;  %v1231_v13 = vld [vmem:[#allocation3 + $0x80] sm:$0xf0]  ;;  %v1230_v14 = vld [vmem:[#allocation3 + $0x7c] sm:$0xf] }
   0x9   :  { %226 = vmatpush.bf16.msra.mxu1 %v1404_v7  ;;  %v1138_v15 = vld [vmem:[#allocation3 + $0x84] sm:$0xf0]  ;;  %v1168_v16 = vld [vmem:[#allocation3 + $0xb0] sm:$0xf]  ;;  %v1238_v17 = vld [vmem:[#allocation3 + $0xb8] sm:$0xf0]  ;;  %v1416_v19 = vor.u32 %v1231_v13, %v1136_v12 }
   0xa   :  { %v1413_v18 = vor.u32 %v1238_v17, %v1168_v16  ;;  %v1156_v20 = vld [vmem:[#allocation3 + $0x98] sm:$0xf]  ;;  %v1235_v21 = vld [vmem:[#allocation3 + $0xa0] sm:$0xf0]  ;;  %v1420_v22 = vor.u32 %v1230_v14, %v1138_v15  ;;  %v1124_v23 = vld [vmem:[#allocation3 + $0x60] sm:$0xf] }
   0xb   :  { %v1228_v24 = vld [vmem:[#allocation3 + $0x68] sm:$0xf0]  ;;  %v1227_v25 = vld [vmem:[#allocation3 + $0x64] sm:$0xf]  ;;  %v1423_v26 = vor.u32 %v1235_v21, %v1156_v20  ;;  %v1126_v27 = vld [vmem:[#allocation3 + $0x6c] sm:$0xf0] }
   0xc   :  { %214 = vmatpush.bf16.msra.mxu0 %v1407_v10  ;;  %319 = vmatpush.bf16.msra.mxu3 %v1407_v10  ;;  %v1144_v28 = vld [vmem:[#allocation3 + $0x80] sm:$0xf]  ;;  %v1232_v29 = vld [vmem:[#allocation3 + $0x88] sm:$0xf0]  ;;  %v1426_v30 = vor.u32 %v1228_v24, %v1124_v23  ;;  %v1430_v31 = vor.u32 %v1227_v25, %v1126_v27  ;;  %v1112_v32 = vld [vmem:[#allocation3 + $0x48] sm:$0xf] }
   0xd   :  { %227 = vmatpush.bf16.msra.mxu1 %v1411_v11  ;;  %239 = vmatpush.bf16.msra.mxu2 %v1413_v18  ;;  %v1225_v33 = vld [vmem:[#allocation3 + $0x50] sm:$0xf0]  ;;  %v1224_v34 = vld [vmem:[#allocation3 + $0x4c] sm:$0xf]  ;;  %v1433_v35 = vor.u32 %v1232_v29, %v1144_v28  ;;  %v1114_v36 = vld [vmem:[#allocation3 + $0x54] sm:$0xf0] }
   0xe   :  { %v1132_v37 = vld [vmem:[#allocation3 + $0x68] sm:$0xf]  ;;  %v1229_v38 = vld [vmem:[#allocation3 + $0x70] sm:$0xf0]  ;;  %v1436_v39 = vor.u32 %v1225_v33, %v1112_v32  ;;  %v1100_v40 = vld [vmem:[#allocation3 + $0x30] sm:$0xf]  ;;  %v1440_v44 = vor.u32 %v1224_v34, %v1114_v36 }
   0xf   :  { %v1222_v41 = vld [vmem:[#allocation3 + $0x38] sm:$0xf0]  ;;  %v1221_v42 = vld [vmem:[#allocation3 + $0x34] sm:$0xf]  ;;  %v1367_v43 = vmov 0   ;;  %v1443_v46 = vor.u32 %v1229_v38, %v1132_v37  ;;  %v1448_v48 = vld [vmem:[%s1801_s0] sm:$0xff] }
  0x10   :  { %215 = vmatpush.bf16.msra.mxu0 %v1416_v19  ;;  %320 = vmatpush.bf16.msra.mxu3 %v1416_v19  ;;  %v1102_v45 = vld [vmem:[#allocation3 + $0x3c] sm:$0xf0]  ;;  %v1120_v47 = vld [vmem:[#allocation3 + $0x50] sm:$0xf]  ;;  %v1226_v49 = vld [vmem:[#allocation3 + $0x58] sm:$0xf0]  ;;  %v1456_v51 = vor.u32 %v1222_v41, %v1100_v40 }
  0x11   :  { %228 = vmatpush.bf16.msra.mxu1 %v1420_v22  ;;  %240 = vmatpush.bf16.msra.mxu2 %v1423_v26  ;;  %vm1172_vm0 = vcmp.gt.s32.totalorder %v1448_v48, 0  ;;  %v1088_v52 = vld [vmem:[#allocation3 + $0x18] sm:$0xf]  ;;  %v1459_v53 = vor.u32 %v1221_v42, %v1102_v45  ;;  %v1219_v54 = vld [vmem:[#allocation3 + $0x20] sm:$0xf0]  ;;  %v1462_v57 = vor.u32 %v1226_v49, %v1120_v47  ;;  %vm1177_vm1 = vcmp.gt.s32.totalorder %v1448_v48, 1 }
  0x12   :  { %1253 = vset.pattern.permute.xlu0 %v1367_v43  ;;  %1254 = vset.pattern.permute.xlu1 %v1367_v43  ;;  %v302_v50 = vsel %vm1172_vm0, 1, %v1367_v43  ;;  %v1218_v55 = vld [vmem:[#allocation3 + $0x1c] sm:$0xf]  ;;  %v1090_v56 = vld [vmem:[#allocation3 + $0x24] sm:$0xf0]  ;;  %v1467_v60 = vor.u32 %v1219_v54, %v1088_v52  ;;  %v408_v2 = vsel %vm1177_vm1, 1, %v1367_v43 }
  0x13   :  { %1255 = vset.pattern.permute.xlu2 %v1367_v43  ;;  %304 = vperm.xlu0 %1253, %v302_v50   ;;  %v1108_v58 = vld [vmem:[#allocation3 + $0x38] sm:$0xf]  ;;  %v1223_v59 = vld [vmem:[#allocation3 + $0x40] sm:$0xf0]  ;;  %v1076_v61 = vld [vmem:[#allocation3] sm:$0xf]  ;;  %v1470_v62 = vor.u32 %v1218_v55, %v1090_v56 }
  0x14   :  { %216 = vmatpush.bf16.msra.mxu0 %v1426_v30  ;;  %321 = vmatpush.bf16.msra.mxu3 %v1426_v30  ;;  %v1216_v63 = vld [vmem:[#allocation3 + $0x8] sm:$0xf0]  ;;  %v1215_v0 = vld [vmem:[#allocation3 + $0x4] sm:$0xf]  ;;  %v1473_v1 = vor.u32 %v1223_v59, %v1108_v58  ;;  %v1078_v4 = vld [vmem:[#allocation3 + $0xc] sm:$0xf0] }
  0x15   :  { %229 = vmatpush.bf16.msra.mxu1 %v1430_v31  ;;  %241 = vmatpush.bf16.msra.mxu2 %v1433_v35  ;;  %v1096_v5 = vld [vmem:[#allocation3 + $0x20] sm:$0xf]  ;;  %v1220_v6 = vld [vmem:[#allocation3 + $0x28] sm:$0xf0]  ;;  %v1478_v8 = vor.u32 %v1216_v63, %v1076_v61  ;;  %v1481_v9 = vor.u32 %v1215_v0, %v1078_v4  ;;  %v1084_v13 = vld [vmem:[#allocation3 + $0x8] sm:$0xf] }
  0x16   :  { %v1484_v12 = vor.u32 %v1220_v6, %v1096_v5  ;;  %v1217_v14 = vld [vmem:[#allocation3 + $0x10] sm:$0xf0]  ;;  %vm1207_vm2 = vcmp.gt.s32.totalorder %v1448_v48, 6  ;;  %v1368_v17 = vmov 0.0|0.0   ;;  %v79_v20 = vld [vmem:[%s1802_s1] sm:$0xff]  ;;  %vm1183_vm13 = vcmp.gt.s32.totalorder %v1448_v48, 2 }
  0x17   :  { %v1491_v15 = vor.u32 %v1217_v14, %v1084_v13  ;;  %v943_v16 = vsel %vm1207_vm2, 1, %v1367_v43  ;;  %v81_v21 = vunpack.c.l.bf16 %v79_v20  ;;  %v82_v23 = vunpack.c.h.bf16 %v79_v20  ;;  %v1558_v52 = vld [vmem:[%s1804_s3] ss:$0 sm:$0xff]  ;;  %v80_v61 = vld [vmem:[%s1802_s1 + $0x8] sm:$0xf] }
  0x18   :  { %217 = vmatpush.bf16.msra.mxu0 %v1436_v39  ;;  %322 = vmatpush.bf16.msra.mxu3 %v1436_v39  ;;  %v83_v5 = vunpack.c.l.bf16 %v80_v61  ;;  %vm1189_vm14 = vcmp.gt.s32.totalorder %v1448_v48, 3 }
  0x19   :  { %230 = vmatpush.bf16.msra.mxu1 %v1440_v44  ;;  %242 = vmatpush.bf16.msra.mxu2 %v1443_v46 }
  0x1b   :  { %410 = vperm.xlu0 %1253, %v408_v2  }
  0x1c   :  { %218 = vmatpush.bf16.msra.mxu0 %v1456_v51  ;;  %323 = vmatpush.bf16.msra.mxu3 %v1456_v51 }
  0x1d   :  { %231 = vmatpush.bf16.msra.mxu1 %v1459_v53  ;;  %243 = vmatpush.bf16.msra.mxu2 %v1462_v57 }
  0x20   :  { %219 = vmatpush.bf16.msra.mxu0 %v1467_v60  ;;  %324 = vmatpush.bf16.msra.mxu3 %v1467_v60 }
  0x21   :  { %232 = vmatpush.bf16.msra.mxu1 %v1470_v62  ;;  %244 = vmatpush.bf16.msra.mxu2 %v1473_v1 }
  0x23   :  { %945 = vperm.xlu0 %1253, %v943_v16  }
  0x24   :  { %220 = vmatpush.bf16.msra.mxu0 %v1478_v8  ;;  %325 = vmatpush.bf16.msra.mxu3 %v1478_v8 }
  0x25   :  { %233 = vmatpush.bf16.msra.mxu1 %v1481_v9  ;;  %245 = vmatpush.bf16.msra.mxu2 %v1484_v12 }
  0x27   :  { %221 = vmatmul.bf16.vlgmr.msra.gmra.mxu0 %v1368_v17 }
  0x28   :  { %331 = vmatpush.bf16.msrb.mxu0 %v1404_v7  ;;  %234 = vmatmul.bf16.vlgmr.msra.gmra.mxu1 %v1368_v17 }
  0x29   :  { %344 = vmatpush.bf16.msrb.mxu1 %v1413_v18  ;;  %246 = vmatpush.bf16.msra.mxu2 %v1491_v15 }
  0x2a   :  { %438 = vmatpush.bf16.msrb.mxu3 %v1404_v7 }
  0x2c   :  { %332 = vmatpush.bf16.msrb.mxu0 %v1411_v11  ;;  %247 = vmatmul.bf16.vlgmr.msra.gmra.mxu2 %v1368_v17 }
  0x2d   :  { %345 = vmatpush.bf16.msrb.mxu1 %v1423_v26  ;;  %425 = vmatpush.bf16.msrb.mxu2 %v1402_v3 }
  0x2e   :  { %439 = vmatpush.bf16.msrb.mxu3 %v1411_v11 }
  0x30   :  { %333 = vmatpush.bf16.msrb.mxu0 %v1420_v22 }
  0x31   :  { %346 = vmatpush.bf16.msrb.mxu1 %v1433_v35  ;;  %426 = vmatpush.bf16.msrb.mxu2 %v1407_v10 }
  0x32   :  { %440 = vmatpush.bf16.msrb.mxu3 %v1420_v22 }
  0x34   :  { %334 = vmatpush.bf16.msrb.mxu0 %v1430_v31 }
  0x35   :  { %347 = vmatpush.bf16.msrb.mxu1 %v1443_v46  ;;  %427 = vmatpush.bf16.msrb.mxu2 %v1416_v19 }
  0x36   :  { %441 = vmatpush.bf16.msrb.mxu3 %v1430_v31 }
  0x38   :  { %335 = vmatpush.bf16.msrb.mxu0 %v1440_v44 }
  0x39   :  { %348 = vmatpush.bf16.msrb.mxu1 %v1462_v57  ;;  %428 = vmatpush.bf16.msrb.mxu2 %v1426_v30 }
  0x3a   :  { %442 = vmatpush.bf16.msrb.mxu3 %v1440_v44 }
  0x3c   :  { %336 = vmatpush.bf16.msrb.mxu0 %v1459_v53 }
  0x3d   :  { %349 = vmatpush.bf16.msrb.mxu1 %v1473_v1  ;;  %429 = vmatpush.bf16.msrb.mxu2 %v1436_v39 }
  0x3e   :  { %443 = vmatpush.bf16.msrb.mxu3 %v1459_v53 }
  0x40   :  { %337 = vmatpush.bf16.msrb.mxu0 %v1470_v62 }
  0x41   :  { %350 = vmatpush.bf16.msrb.mxu1 %v1484_v12  ;;  %430 = vmatpush.bf16.msrb.mxu2 %v1456_v51 }
  0x42   :  { %444 = vmatpush.bf16.msrb.mxu3 %v1470_v62 }
  0x44   :  { %338 = vmatpush.bf16.msrb.mxu0 %v1481_v9 }
  0x45   :  { %351 = vmatpush.bf16.msrb.mxu1 %v1491_v15  ;;  %431 = vmatpush.bf16.msrb.mxu2 %v1467_v60 }
  0x46   :  { %445 = vmatpush.bf16.msrb.mxu3 %v1481_v9 }
  0x48   :  { %451 = vmatpush.bf16.msra.mxu0 %v1413_v18 }
  0x49   :  { %532 = vmatpush.bf16.msra.mxu1 %v1402_v3  ;;  %432 = vmatpush.bf16.msrb.mxu2 %v1478_v8 }
  0x4c   :  { %452 = vmatpush.bf16.msra.mxu0 %v1423_v26 }
  0x4d   :  { %545 = vmatpush.bf16.msra.mxu2 %v1404_v7  ;;  %533 = vmatpush.bf16.msra.mxu1 %v1407_v10 }
  0x50   :  { %453 = vmatpush.bf16.msra.mxu0 %v1433_v35 }
  0x51   :  { %546 = vmatpush.bf16.msra.mxu2 %v1411_v11  ;;  %534 = vmatpush.bf16.msra.mxu1 %v1416_v19 }
  0x54   :  { %454 = vmatpush.bf16.msra.mxu0 %v1443_v46 }
  0x55   :  { %547 = vmatpush.bf16.msra.mxu2 %v1420_v22  ;;  %535 = vmatpush.bf16.msra.mxu1 %v1426_v30 }
  0x58   :  { %455 = vmatpush.bf16.msra.mxu0 %v1462_v57 }
  0x59   :  { %548 = vmatpush.bf16.msra.mxu2 %v1430_v31  ;;  %536 = vmatpush.bf16.msra.mxu1 %v1436_v39 }
  0x5c   :  { %456 = vmatpush.bf16.msra.mxu0 %v1473_v1 }
  0x5d   :  { %549 = vmatpush.bf16.msra.mxu2 %v1440_v44  ;;  %537 = vmatpush.bf16.msra.mxu1 %v1456_v51 }
  0x60   :  { %457 = vmatpush.bf16.msra.mxu0 %v1484_v12 }
  0x61   :  { %550 = vmatpush.bf16.msra.mxu2 %v1459_v53  ;;  %538 = vmatpush.bf16.msra.mxu1 %v1467_v60 }
  0x64   :  { %458 = vmatpush.bf16.msra.mxu0 %v1491_v15 }
  0x65   :  { %551 = vmatpush.bf16.msra.mxu2 %v1470_v62  ;;  %539 = vmatpush.bf16.msra.mxu1 %v1478_v8 }
  0x69   :  { %552 = vmatpush.bf16.msra.mxu2 %v1481_v9 }
  0xa4   :  { %v222_v24 = vpop.f32.mrf.mxu0 }
  0xa5   :  { %v252_v25 = vadd.f32 %v222_v24, %v81_v21  ;;  %v235_v27 = vpop.f32.mrf.mxu1 }
  0xa6   :  { %v253_v28 = vadd.f32 %v235_v27, %v82_v23 }
  0xa7   :  { %v1170_v29 = vmul.f32 -1.442695, %v252_v25 }
  0xa8   :  { %v1171_v32 = vmul.f32 -1.442695, %v253_v28 }
  0xa9   :  { %1257 = vpow2.f32 %v1170_v29  ;;  %v305_v29 = vpop.permute.xlu0 %304 }
  0xaa   :  { %1259 = vpow2.f32 %v1171_v32  ;;  %vm306_vm11 = vcmp.eq.s32.totalorder %v305_v29, 1 }
  0xab   :  { %vm1239_vm12 = vmpackc.low %vm306_vm11, %vm306_vm11 }
  0xac   :  { %v224_v33 = vpop.f32.mrf.mxu0 }
  0xad   :  { %v237_v34 = vpop.f32.mrf.mxu1 }
  0xaf   :  { %v1258_v36 = vpop.eup %1257  ;;  %v248_v37 = vpop.f32.mrf.mxu2 }
  0xb0   :  { %v1260_v38 = vpop.eup %1259  ;;  %v260_v40 = vadd.f32 1.0, %v1258_v36  ;;  %v292_v2 = vadd.f32 %v1558_v52, %v248_v37 }
  0xb1   :  { %v261_v41 = vadd.f32 1.0, %v1260_v38 }
  0xb2   :  { %1261 = vrcp.f32 %v260_v40  ;;  %v273_v56 = vand.u32 2147483648, %v260_v40  ;;  %v271_v59 = vand.u32 2147483647, %v260_v40  ;;  %vm267_vm4 = vweird.f32 %v260_v40 }
  0xb3   :  { %1263 = vrcp.f32 %v261_v41  ;;  %vm282_vm7 = vweird.f32 %v261_v41  ;;  %v288_v17 = vand.u32 2147483648, %v261_v41  ;;  %v286_v20 = vand.u32 2147483647, %v261_v41 }
  0xb4   :  { %v274_v4 = vor.u32 1.1754944e-38, %v273_v56  ;;  %vm272_vm6 = vcmp.eq.f32.partialorder %v271_v59, 8.507059e+37 }
  0xb5   :  { %v289_v24 = vor.u32 1.1754944e-38, %v288_v17  ;;  %vm287_vm10 = vcmp.eq.f32.partialorder %v286_v20, 8.507059e+37 }
  0xb7   :  { %v250_v42 = vpop.f32.mrf.mxu2 }
  0xb8   :  { %v1262_v45 = vpop.eup %1261 }
  0xb9   :  { %v1264_v47 = vpop.eup %1263  ;;  %v263_v49 = vmul.f32 %v1262_v45, %v260_v40  ;;  %vm268_vm3 = vweird.f32 %v1262_v45  ;;  %v1173_v40 = vld [vmem:[%s1802_s1 + $0xc] sm:$0xff] }
  0xba   :  { %v278_v50 = vmul.f32 %v1264_v47, %v261_v41  ;;  %vm269_vm5 = vmor %vm267_vm4, %vm268_vm3  ;;  %vm283_vm8 = vweird.f32 %v1264_v47  ;;  %v315_v41 = vunpack.c.h.bf16 %v1173_v40  ;;  %vm1213_vm4 = vcmp.gt.s32.totalorder %v1448_v48, 7 }
  0xbb   :  { %v264_v54 = vsub.f32 1.0, %v263_v49  ;;  %vm284_vm9 = vmor %vm282_vm7, %vm283_vm8 }
  0xbc   :  { %v279_v55 = vsub.f32 1.0, %v278_v50  ;;  %v314_v50 = vunpack.c.l.bf16 %v1173_v40 }
  0xbd   :  { %v265_v58 = vmul.f32 %v1262_v45, %v264_v54 }
  0xbe   :  { %v280_v63 = vmul.f32 %v1264_v47, %v279_v55 }
  0xbf   :  { %v266_v0 = vadd.f32 %v1262_v45, %v265_v58 }
  0xc0   :  { %v281_v14 = vadd.f32 %v1264_v47, %v280_v63 }
  0xc1   :  { %v270_v6 = vsel %vm269_vm5, %v1262_v45, %v266_v0 }
  0xc2   :  { %v275_v13 = vsel %vm272_vm6, %v274_v4, %v270_v6  ;;  %v285_v23 = vsel %vm284_vm9, %v1264_v47, %v281_v14 }
  0xc3   :  { %v293_v16 = vmul.f32 %v292_v2, %v275_v13  ;;  %v290_v25 = vsel %vm287_vm10, %v289_v24, %v285_v23  ;;  %v515_v13 = vsel %vm1183_vm13, 1, %v1367_v43 }
  0xc4   :  { %v296_v27 = vsub.f32 1.0, %v290_v25  ;;  %v298_v33 = vmul.f32 0.0, %v290_v25  ;;  %517 = vperm.xlu1 %1254, %v515_v13   ;;  %v622_v25 = vsel %vm1189_vm14, 1, %v1367_v43 }
  0xc5   :  { %v294_v21 = vadd.f32 %v293_v16, %v83_v5 }
  0xc7   :  { %1265 = vtanh.f32 %v294_v21 }
  0xcc   :  { %624 = vperm.xlu1 %1254, %v622_v25  }
  0xcd   :  { %v1266_v28 = vpop.eup %1265 }
  0xce   :  { %v297_v32 = vmul.f32 %v1266_v28, %v296_v27  ;;  %v1174_v28 = vld [vmem:[%s1802_s1 + $0x14] sm:$0xf] }
  0xd0   :  { %v299_v34 = vadd.f32 %v298_v33, %v297_v32 }
  0xd2   :  { %v1564_v36 = vsel %vm306_vm11, %v299_v34, 0.0  ;;  %v1240_v37 = vpack.c.bf16 %v299_v34, %v299_v34 }
  0xd3   :  { %v309_v38 = vpack.c.bf16 %v1564_v36, %v1564_v36 }
  0xd4   :  { %1241 = vmatmul.msk.bf16.vlgmr.msra.gmra.mxu3 %vm1239_vm12, %v1240_v37  ;;  %1244 = vmatmul.msk.bf16.vlgmr.msrb.gmra.mxu0 %vm1239_vm12, %v1240_v37 }
  0xd5   :  { %310 = vst [vmem:[%s1805_s4] sm:$0xf] %v309_v38  ;;  %1247 = vmatmul.msk.bf16.vlgmr.msrb.gmra.mxu1 %vm1239_vm12, %v1240_v37  ;;  %558 = vmatpush.bf16.msra.mxu3 %v1413_v18  ;;  %v316_v37 = vunpack.c.l.bf16 %v1174_v28 }
  0xd6   :  { %639 = vmatpush.bf16.msrb.mxu0 %v1402_v3  ;;  %652 = vmatpush.bf16.msrb.mxu1 %v1404_v7 }
  0xd9   :  { %559 = vmatpush.bf16.msra.mxu3 %v1423_v26 }
  0xda   :  { %640 = vmatpush.bf16.msrb.mxu0 %v1407_v10  ;;  %653 = vmatpush.bf16.msrb.mxu1 %v1411_v11 }
  0xdd   :  { %560 = vmatpush.bf16.msra.mxu3 %v1433_v35 }
  0xde   :  { %641 = vmatpush.bf16.msrb.mxu0 %v1416_v19  ;;  %654 = vmatpush.bf16.msrb.mxu1 %v1420_v22 }
  0xe1   :  { %561 = vmatpush.bf16.msra.mxu3 %v1443_v46 }
  0xe2   :  { %642 = vmatpush.bf16.msrb.mxu0 %v1426_v30  ;;  %655 = vmatpush.bf16.msrb.mxu1 %v1430_v31 }
  0xe5   :  { %562 = vmatpush.bf16.msra.mxu3 %v1462_v57 }
  0xe6   :  { %643 = vmatpush.bf16.msrb.mxu0 %v1436_v39  ;;  %656 = vmatpush.bf16.msrb.mxu1 %v1440_v44 }
  0xe9   :  { %563 = vmatpush.bf16.msra.mxu3 %v1473_v1 }
  0xea   :  { %644 = vmatpush.bf16.msrb.mxu0 %v1456_v51  ;;  %657 = vmatpush.bf16.msrb.mxu1 %v1459_v53 }
  0xed   :  { %564 = vmatpush.bf16.msra.mxu3 %v1484_v12 }
  0xee   :  { %645 = vmatpush.bf16.msrb.mxu0 %v1467_v60  ;;  %658 = vmatpush.bf16.msrb.mxu1 %v1470_v62 }
  0xf1   :  { %565 = vmatpush.bf16.msra.mxu3 %v1491_v15 }
  0xf2   :  { %646 = vmatpush.bf16.msrb.mxu0 %v1478_v8  ;;  %659 = vmatpush.bf16.msrb.mxu1 %v1481_v9 }
 0x151   :  { %v340_v42 = vpop.f32.mrf.mxu0 }
 0x152   :  { %v358_v45 = vadd.f32 %v340_v42, %v315_v41  ;;  %v353_v47 = vpop.f32.mrf.mxu1 }
 0x153   :  { %v397_v33 = vadd.f32 %v1558_v52, %v353_v47 }
 0x154   :  { %v1176_v49 = vmul.f32 -1.442695, %v358_v45 }
 0x156   :  { %1267 = vpow2.f32 %v1176_v49 }
 0x157   :  { %v327_v54 = vpop.f32.mrf.mxu3 }
 0x158   :  { %v357_v55 = vadd.f32 %v327_v54, %v314_v50  ;;  %v1050_v50 = vsel %vm1213_vm4, 1, %v1367_v43 }
 0x159   :  { %v342_v56 = vpop.f32.mrf.mxu0  ;;  %1052 = vperm.xlu1 %1254, %v1050_v50  }
 0x15a   :  { %v1175_v58 = vmul.f32 -1.442695, %v357_v55  ;;  %v355_v59 = vpop.f32.mrf.mxu1 }
 0x15c   :  { %v1268_v61 = vpop.eup %1267  ;;  %1269 = vpow2.f32 %v1175_v58 }
 0x15d   :  { %v366_v63 = vadd.f32 1.0, %v1268_v61 }
 0x15f   :  { %v329_v0 = vpop.f32.mrf.mxu3  ;;  %1271 = vrcp.f32 %v366_v63  ;;  %v393_v41 = vand.u32 2147483648, %v366_v63  ;;  %vm387_vm5 = vweird.f32 %v366_v63  ;;  %v391_v45 = vand.u32 2147483647, %v366_v63 }
 0x160   :  { %v411_v0 = vpop.permute.xlu0 %410 }
 0x161   :  { %v394_v55 = vor.u32 1.1754944e-38, %v393_v41  ;;  %vm392_vm7 = vcmp.eq.f32.partialorder %v391_v45, 8.507059e+37  ;;  %vm412_vm8 = vcmp.eq.s32.totalorder %v411_v0, 1 }
 0x162   :  { %v1270_v2 = vpop.eup %1269 }
 0x163   :  { %v365_v4 = vadd.f32 1.0, %v1270_v2 }
 0x165   :  { %1273 = vrcp.f32 %v365_v4  ;;  %v1272_v5 = vpop.eup %1271  ;;  %v378_v21 = vand.u32 2147483648, %v365_v4  ;;  %v376_v24 = vand.u32 2147483647, %v365_v4  ;;  %vm372_vm0 = vweird.f32 %v365_v4 }
 0x166   :  { %v383_v6 = vmul.f32 %v1272_v5, %v366_v63  ;;  %vm388_vm3 = vweird.f32 %v1272_v5 }
 0x167   :  { %v379_v32 = vor.u32 1.1754944e-38, %v378_v21  ;;  %vm377_vm2 = vcmp.eq.f32.partialorder %v376_v24, 8.507059e+37  ;;  %vm389_vm6 = vmor %vm387_vm5, %vm388_vm3  ;;  %vm1201_vm3 = vcmp.gt.s32.totalorder %v1448_v48, 5 }
 0x168   :  { %v384_v17 = vsub.f32 1.0, %v383_v6 }
 0x16a   :  { %v385_v27 = vmul.f32 %v1272_v5, %v384_v17 }
 0x16b   :  { %v1274_v14 = vpop.eup %1273 }
 0x16c   :  { %v368_v16 = vmul.f32 %v1274_v14, %v365_v4  ;;  %vm373_vm15 = vweird.f32 %v1274_v14  ;;  %v386_v38 = vadd.f32 %v1272_v5, %v385_v27 }
 0x16d   :  { %vm374_vm1 = vmor %vm372_vm0, %vm373_vm15 }
 0x16e   :  { %v369_v20 = vsub.f32 1.0, %v368_v16  ;;  %v390_v54 = vsel %vm389_vm6, %v1272_v5, %v386_v38 }
 0x16f   :  { %v395_v47 = vsel %vm392_vm7, %v394_v55, %v390_v54 }
 0x170   :  { %v370_v23 = vmul.f32 %v1274_v14, %v369_v20  ;;  %v401_v56 = vsub.f32 1.0, %v395_v47  ;;  %v403_v61 = vmul.f32 %v395_v47, %v1564_v36  ;;  %v1180_v47 = vld [vmem:[%s1802_s1 + $0x20] sm:$0xf] }
 0x171   :  { %v423_v0 = vunpack.c.l.bf16 %v1180_v47 }
 0x172   :  { %v371_v29 = vadd.f32 %v1274_v14, %v370_v23 }
 0x174   :  { %v375_v34 = vsel %vm374_vm1, %v1274_v14, %v371_v29 }
 0x175   :  { %v380_v40 = vsel %vm377_vm2, %v379_v32, %v375_v34  ;;  %vm1195_vm2 = vcmp.gt.s32.totalorder %v1448_v48, 4 }
 0x176   :  { %v398_v42 = vmul.f32 %v397_v33, %v380_v40 }
 0x178   :  { %v399_v49 = vadd.f32 %v398_v42, %v316_v37 }
 0x17a   :  { %1275 = vtanh.f32 %v399_v49 }
 0x180   :  { %v1276_v58 = vpop.eup %1275 }
 0x181   :  { %v402_v59 = vmul.f32 %v1276_v58, %v401_v56 }
 0x183   :  { %v404_v2 = vadd.f32 %v403_v61, %v402_v59 }
 0x185   :  { %v1610_v63 = vsel %vm412_vm8, %v404_v2, %v1564_v36  ;;  %v414_v4 = vsel %vm412_vm8, %v404_v2, 0.0  ;;  %v1179_v36 = vld [vmem:[%s1802_s1 + $0x18] sm:$0xff] }
 0x186   :  { %v415_v6 = vpack.c.bf16 %v414_v4, %v414_v4  ;;  %v424_v5 = vpack.c.bf16 %v1610_v63, %v1610_v63  ;;  %v421_v14 = vunpack.c.l.bf16 %v1179_v36  ;;  %v422_v16 = vunpack.c.h.bf16 %v1179_v36 }
 0x188   :  { %1178 = vst [vmem:[%s1805_s4 + $0x4] sm:$0xf] %v415_v6  ;;  %433 = vmatmul.bf16.vlgmr.msrb.gmra.mxu2 %v424_v5  ;;  %446 = vmatmul.bf16.vlgmr.msrb.gmra.mxu3 %v424_v5 }
 0x189   :  { %459 = vmatmul.bf16.vlgmr.msra.gmra.mxu0 %v424_v5  ;;  %665 = vmatpush.bf16.msrb.mxu2 %v1413_v18 }
 0x18a   :  { %746 = vmatpush.bf16.msrb.mxu3 %v1402_v3  ;;  %759 = vmatpush.bf16.msra.mxu0 %v1404_v7 }
 0x18d   :  { %666 = vmatpush.bf16.msrb.mxu2 %v1423_v26 }
 0x18e   :  { %747 = vmatpush.bf16.msrb.mxu3 %v1407_v10  ;;  %760 = vmatpush.bf16.msra.mxu0 %v1411_v11 }
 0x191   :  { %667 = vmatpush.bf16.msrb.mxu2 %v1433_v35 }
 0x192   :  { %748 = vmatpush.bf16.msrb.mxu3 %v1416_v19  ;;  %761 = vmatpush.bf16.msra.mxu0 %v1420_v22 }
 0x195   :  { %668 = vmatpush.bf16.msrb.mxu2 %v1443_v46 }
 0x196   :  { %749 = vmatpush.bf16.msrb.mxu3 %v1426_v30  ;;  %762 = vmatpush.bf16.msra.mxu0 %v1430_v31 }
 0x199   :  { %669 = vmatpush.bf16.msrb.mxu2 %v1462_v57 }
 0x19a   :  { %750 = vmatpush.bf16.msrb.mxu3 %v1436_v39  ;;  %763 = vmatpush.bf16.msra.mxu0 %v1440_v44 }
 0x19d   :  { %670 = vmatpush.bf16.msrb.mxu2 %v1473_v1 }
 0x19e   :  { %751 = vmatpush.bf16.msrb.mxu3 %v1456_v51  ;;  %764 = vmatpush.bf16.msra.mxu0 %v1459_v53 }
 0x1a1   :  { %671 = vmatpush.bf16.msrb.mxu2 %v1484_v12 }
 0x1a2   :  { %752 = vmatpush.bf16.msrb.mxu3 %v1467_v60  ;;  %765 = vmatpush.bf16.msra.mxu0 %v1470_v62 }
 0x1a5   :  { %672 = vmatpush.bf16.msrb.mxu2 %v1491_v15 }
 0x1a6   :  { %753 = vmatpush.bf16.msrb.mxu3 %v1478_v8  ;;  %766 = vmatpush.bf16.msra.mxu0 %v1481_v9 }
 0x206   :  { %v460_v13 = vpop.f32.mrf.mxu0 }
 0x207   :  { %v504_v61 = vadd.f32 %v1558_v52, %v460_v13  ;;  %v518_v13 = vpop.permute.xlu1 %517 }
 0x208   :  { %vm519_vm1 = vcmp.eq.s32.totalorder %v518_v13, 1 }
 0x20b   :  { %v434_v17 = vpop.f32.mrf.mxu2  ;;  %v447_v20 = vpop.f32.mrf.mxu3 }
 0x20c   :  { %v464_v21 = vadd.f32 %v434_v17, %v421_v14  ;;  %v465_v23 = vadd.f32 %v447_v20, %v422_v16 }
 0x20e   :  { %v1181_v24 = vmul.f32 -1.442695, %v464_v21  ;;  %v1182_v25 = vmul.f32 -1.442695, %v465_v23  ;;  %v462_v27 = vpop.f32.mrf.mxu0 }
 0x210   :  { %1277 = vpow2.f32 %v1181_v24 }
 0x211   :  { %1279 = vpow2.f32 %v1182_v25 }
 0x213   :  { %v436_v28 = vpop.f32.mrf.mxu2  ;;  %v449_v29 = vpop.f32.mrf.mxu3 }
 0x216   :  { %v1278_v32 = vpop.eup %1277 }
 0x217   :  { %v1280_v33 = vpop.eup %1279  ;;  %v472_v34 = vadd.f32 1.0, %v1278_v32 }
 0x218   :  { %v473_v37 = vadd.f32 1.0, %v1280_v33 }
 0x219   :  { %1281 = vrcp.f32 %v472_v34  ;;  %v485_v49 = vand.u32 2147483648, %v472_v34  ;;  %v483_v55 = vand.u32 2147483647, %v472_v34  ;;  %vm479_vm10 = vweird.f32 %v472_v34 }
 0x21a   :  { %1283 = vrcp.f32 %v473_v37  ;;  %v500_v5 = vand.u32 2147483648, %v473_v37  ;;  %vm494_vm14 = vweird.f32 %v473_v37  ;;  %v498_v14 = vand.u32 2147483647, %v473_v37 }
 0x21b   :  { %v486_v59 = vor.u32 1.1754944e-38, %v485_v49  ;;  %vm484_vm12 = vcmp.eq.f32.partialorder %v483_v55, 8.507059e+37 }
 0x21c   :  { %v501_v20 = vor.u32 1.1754944e-38, %v500_v5  ;;  %vm499_vm0 = vcmp.eq.f32.partialorder %v498_v14, 8.507059e+37  ;;  %v1186_v14 = vld [vmem:[%s1802_s1 + $0x2c] sm:$0xf] }
 0x21d   :  { %v530_v13 = vunpack.c.l.bf16 %v1186_v14 }
 0x21f   :  { %v1282_v38 = vpop.eup %1281 }
 0x220   :  { %v1284_v40 = vpop.eup %1283  ;;  %v475_v41 = vmul.f32 %v1282_v38, %v472_v34  ;;  %vm480_vm9 = vweird.f32 %v1282_v38 }
 0x221   :  { %v490_v42 = vmul.f32 %v1284_v40, %v473_v37  ;;  %vm481_vm11 = vmor %vm479_vm10, %vm480_vm9  ;;  %vm495_vm13 = vweird.f32 %v1284_v40 }
 0x222   :  { %v476_v45 = vsub.f32 1.0, %v475_v41  ;;  %vm496_vm15 = vmor %vm494_vm14, %vm495_vm13 }
 0x223   :  { %v491_v50 = vsub.f32 1.0, %v490_v42 }
 0x224   :  { %v477_v54 = vmul.f32 %v1282_v38, %v476_v45 }
 0x225   :  { %v492_v56 = vmul.f32 %v1284_v40, %v491_v50 }
 0x226   :  { %v478_v58 = vadd.f32 %v1282_v38, %v477_v54 }
 0x227   :  { %v493_v6 = vadd.f32 %v1284_v40, %v492_v56 }
 0x228   :  { %v482_v2 = vsel %vm481_vm11, %v1282_v38, %v478_v58 }
 0x229   :  { %v487_v4 = vsel %vm484_vm12, %v486_v59, %v482_v2  ;;  %v497_v17 = vsel %vm496_vm15, %v1284_v40, %v493_v6  ;;  %v729_v2 = vsel %vm1195_vm2, 1, %v1367_v43 }
 0x22a   :  { %v505_v36 = vmul.f32 %v504_v61, %v487_v4  ;;  %v502_v21 = vsel %vm499_vm0, %v501_v20, %v497_v17  ;;  %731 = vperm.xlu2 %1255, %v729_v2   ;;  %v836_v20 = vsel %vm1201_vm3, 1, %v1367_v43 }
 0x22b   :  { %v508_v23 = vsub.f32 1.0, %v502_v21  ;;  %v510_v27 = vmul.f32 %v502_v21, %v1610_v63 }
 0x22c   :  { %v506_v16 = vadd.f32 %v505_v36, %v423_v0 }
 0x22e   :  { %1285 = vtanh.f32 %v506_v16 }
 0x232   :  { %838 = vperm.xlu2 %1255, %v836_v20   ;;  %v1192_v20 = vld [vmem:[%s1802_s1 + $0x38] sm:$0xf] }
 0x234   :  { %v1286_v24 = vpop.eup %1285 }
 0x235   :  { %v509_v25 = vmul.f32 %v1286_v24, %v508_v23 }
 0x237   :  { %v511_v28 = vadd.f32 %v510_v27, %v509_v25 }
 0x239   :  { %v1650_v29 = vsel %vm519_vm1, %v511_v28, %v1610_v63  ;;  %v521_v32 = vsel %vm519_vm1, %v511_v28, 0.0  ;;  %v1185_v63 = vld [vmem:[%s1802_s1 + $0x24] sm:$0xff] }
 0x23a   :  { %v522_v33 = vpack.c.bf16 %v521_v32, %v521_v32  ;;  %v531_v34 = vpack.c.bf16 %v1650_v29, %v1650_v29  ;;  %v528_v37 = vunpack.c.l.bf16 %v1185_v63  ;;  %v529_v42 = vunpack.c.h.bf16 %v1185_v63 }
 0x23c   :  { %1184 = vst [vmem:[%s1805_s4 + $0x8] sm:$0xf] %v522_v33  ;;  %540 = vmatmul.bf16.vlgmr.msra.gmra.mxu1 %v531_v34  ;;  %553 = vmatmul.bf16.vlgmr.msra.gmra.mxu2 %v531_v34 }
 0x23d   :  { %566 = vmatmul.bf16.vlgmr.msra.gmra.mxu3 %v531_v34  ;;  %772 = vmatpush.bf16.msra.mxu1 %v1413_v18 }
 0x23e   :  { %853 = vmatpush.bf16.msra.mxu2 %v1402_v3  ;;  %866 = vmatpush.bf16.msra.mxu3 %v1404_v7 }
 0x241   :  { %773 = vmatpush.bf16.msra.mxu1 %v1423_v26 }
 0x242   :  { %854 = vmatpush.bf16.msra.mxu2 %v1407_v10  ;;  %867 = vmatpush.bf16.msra.mxu3 %v1411_v11 }
 0x245   :  { %774 = vmatpush.bf16.msra.mxu1 %v1433_v35 }
 0x246   :  { %855 = vmatpush.bf16.msra.mxu2 %v1416_v19  ;;  %868 = vmatpush.bf16.msra.mxu3 %v1420_v22 }
 0x249   :  { %775 = vmatpush.bf16.msra.mxu1 %v1443_v46 }
 0x24a   :  { %856 = vmatpush.bf16.msra.mxu2 %v1426_v30  ;;  %869 = vmatpush.bf16.msra.mxu3 %v1430_v31 }
 0x24d   :  { %776 = vmatpush.bf16.msra.mxu1 %v1462_v57 }
 0x24e   :  { %857 = vmatpush.bf16.msra.mxu2 %v1436_v39  ;;  %870 = vmatpush.bf16.msra.mxu3 %v1440_v44 }
 0x251   :  { %777 = vmatpush.bf16.msra.mxu1 %v1473_v1 }
 0x252   :  { %858 = vmatpush.bf16.msra.mxu2 %v1456_v51  ;;  %871 = vmatpush.bf16.msra.mxu3 %v1459_v53 }
 0x255   :  { %778 = vmatpush.bf16.msra.mxu1 %v1484_v12 }
 0x256   :  { %859 = vmatpush.bf16.msra.mxu2 %v1467_v60  ;;  %872 = vmatpush.bf16.msra.mxu3 %v1470_v62 }
 0x259   :  { %779 = vmatpush.bf16.msra.mxu1 %v1491_v15 }
 0x25a   :  { %860 = vmatpush.bf16.msra.mxu2 %v1478_v8  ;;  %873 = vmatpush.bf16.msra.mxu3 %v1481_v9 }
 0x2b9   :  { %v541_v38 = vpop.f32.mrf.mxu1 }
 0x2ba   :  { %v571_v40 = vadd.f32 %v541_v38, %v528_v37 }
 0x2bc   :  { %v1187_v41 = vmul.f32 -1.442695, %v571_v40 }
 0x2be   :  { %1287 = vpow2.f32 %v1187_v41 }
 0x2bf   :  { %v554_v45 = vpop.f32.mrf.mxu2 }
 0x2c0   :  { %v572_v49 = vadd.f32 %v554_v45, %v529_v42  ;;  %v567_v50 = vpop.f32.mrf.mxu3 }
 0x2c1   :  { %v543_v54 = vpop.f32.mrf.mxu1  ;;  %v611_v28 = vadd.f32 %v1558_v52, %v567_v50 }
 0x2c2   :  { %v1188_v55 = vmul.f32 -1.442695, %v572_v49 }
 0x2c4   :  { %v1288_v47 = vpop.eup %1287  ;;  %1289 = vpow2.f32 %v1188_v55  ;;  %v625_v55 = vpop.permute.xlu1 %624 }
 0x2c5   :  { %v579_v56 = vadd.f32 1.0, %v1288_v47  ;;  %vm626_vm12 = vcmp.eq.s32.totalorder %v625_v55, 1 }
 0x2c7   :  { %1291 = vrcp.f32 %v579_v56  ;;  %v556_v58 = vpop.f32.mrf.mxu2  ;;  %v592_v36 = vand.u32 2147483648, %v579_v56  ;;  %v590_v17 = vand.u32 2147483647, %v579_v56  ;;  %vm586_vm5 = vweird.f32 %v579_v56 }
 0x2c8   :  { %v569_v59 = vpop.f32.mrf.mxu3 }
 0x2c9   :  { %v593_v25 = vor.u32 1.1754944e-38, %v592_v36  ;;  %vm591_vm7 = vcmp.eq.f32.partialorder %v590_v17, 8.507059e+37 }
 0x2ca   :  { %v1290_v61 = vpop.eup %1289 }
 0x2cb   :  { %v580_v0 = vadd.f32 1.0, %v1290_v61 }
 0x2cd   :  { %v1292_v4 = vpop.eup %1291  ;;  %1293 = vrcp.f32 %v580_v0  ;;  %v607_v34 = vand.u32 2147483648, %v580_v0  ;;  %v605_v37 = vand.u32 2147483647, %v580_v0  ;;  %vm601_vm9 = vweird.f32 %v580_v0 }
 0x2ce   :  { %v582_v6 = vmul.f32 %v1292_v4, %v579_v56  ;;  %vm587_vm4 = vweird.f32 %v1292_v4 }
 0x2cf   :  { %vm588_vm6 = vmor %vm586_vm5, %vm587_vm4  ;;  %v608_v40 = vor.u32 1.1754944e-38, %v607_v34  ;;  %vm606_vm11 = vcmp.eq.f32.partialorder %v605_v37, 8.507059e+37 }
 0x2d0   :  { %v583_v5 = vsub.f32 1.0, %v582_v6 }
 0x2d2   :  { %v584_v16 = vmul.f32 %v1292_v4, %v583_v5 }
 0x2d3   :  { %v1294_v21 = vpop.eup %1293 }
 0x2d4   :  { %v597_v23 = vmul.f32 %v1294_v21, %v580_v0  ;;  %v585_v24 = vadd.f32 %v1292_v4, %v584_v16  ;;  %vm602_vm8 = vweird.f32 %v1294_v21 }
 0x2d5   :  { %vm603_vm10 = vmor %vm601_vm9, %vm602_vm8 }
 0x2d6   :  { %v598_v48 = vsub.f32 1.0, %v597_v23  ;;  %v589_v27 = vsel %vm588_vm6, %v1292_v4, %v585_v24 }
 0x2d7   :  { %v594_v32 = vsel %vm591_vm7, %v593_v25, %v589_v27 }
 0x2d8   :  { %v599_v33 = vmul.f32 %v1294_v21, %v598_v48  ;;  %v612_v63 = vmul.f32 %v611_v28, %v594_v32 }
 0x2da   :  { %v600_v43 = vadd.f32 %v1294_v21, %v599_v33  ;;  %v613_v38 = vadd.f32 %v612_v63, %v530_v13  ;;  %v637_v13 = vunpack.c.l.bf16 %v1192_v20 }
 0x2dc   :  { %v604_v41 = vsel %vm603_vm10, %v1294_v21, %v600_v43  ;;  %1295 = vtanh.f32 %v613_v38 }
 0x2dd   :  { %v609_v42 = vsel %vm606_vm11, %v608_v40, %v604_v41 }
 0x2de   :  { %v615_v45 = vsub.f32 1.0, %v609_v42  ;;  %v617_v50 = vmul.f32 %v609_v42, %v1650_v29  ;;  %v732_v42 = vpop.permute.xlu2 %731 }
 0x2df   :  { %vm733_vm5 = vcmp.eq.s32.totalorder %v732_v42, 1 }
 0x2e2   :  { %v1296_v49 = vpop.eup %1295 }
 0x2e3   :  { %v616_v54 = vmul.f32 %v1296_v49, %v615_v45 }
 0x2e5   :  { %v618_v47 = vadd.f32 %v617_v50, %v616_v54 }
 0x2e7   :  { %v628_v56 = vsel %vm626_vm12, %v618_v47, 0.0  ;;  %v1694_v58 = vsel %vm626_vm12, %v618_v47, %v1650_v29 }
 0x2e8   :  { %v629_v59 = vpack.c.bf16 %v628_v56, %v628_v56  ;;  %v638_v61 = vpack.c.bf16 %v1694_v58, %v1694_v58 }
 0x2ea   :  { %1190 = vst [vmem:[%s1805_s4 + $0xc] sm:$0xf] %v629_v59  ;;  %647 = vmatmul.bf16.vlgmr.msrb.gmra.mxu0 %v638_v61  ;;  %660 = vmatmul.bf16.vlgmr.msrb.gmra.mxu1 %v638_v61 }
 0x2eb   :  { %673 = vmatmul.bf16.vlgmr.msrb.gmra.mxu2 %v638_v61  ;;  %879 = vmatpush.bf16.msrb.mxu0 %v1413_v18 }
 0x2ec   :  { %960 = vmatpush.bf16.msrb.mxu1 %v1402_v3  ;;  %973 = vmatpush.bf16.msrb.mxu2 %v1404_v7  ;;  %v1191_v3 = vld [vmem:[%s1802_s1 + $0x30] sm:$0xff] }
 0x2ed   :  { %v635_v7 = vunpack.c.l.bf16 %v1191_v3 }
 0x2ef   :  { %880 = vmatpush.bf16.msrb.mxu0 %v1423_v26 }
 0x2f0   :  { %961 = vmatpush.bf16.msrb.mxu1 %v1407_v10  ;;  %974 = vmatpush.bf16.msrb.mxu2 %v1411_v11  ;;  %v636_v10 = vunpack.c.h.bf16 %v1191_v3 }
 0x2f3   :  { %881 = vmatpush.bf16.msrb.mxu0 %v1433_v35 }
 0x2f4   :  { %962 = vmatpush.bf16.msrb.mxu1 %v1416_v19  ;;  %975 = vmatpush.bf16.msrb.mxu2 %v1420_v22 }
 0x2f7   :  { %882 = vmatpush.bf16.msrb.mxu0 %v1443_v46 }
 0x2f8   :  { %963 = vmatpush.bf16.msrb.mxu1 %v1426_v30  ;;  %976 = vmatpush.bf16.msrb.mxu2 %v1430_v31 }
 0x2fb   :  { %883 = vmatpush.bf16.msrb.mxu0 %v1462_v57 }
 0x2fc   :  { %964 = vmatpush.bf16.msrb.mxu1 %v1436_v39  ;;  %977 = vmatpush.bf16.msrb.mxu2 %v1440_v44 }
 0x2ff   :  { %884 = vmatpush.bf16.msrb.mxu0 %v1473_v1 }
 0x300   :  { %965 = vmatpush.bf16.msrb.mxu1 %v1456_v51  ;;  %978 = vmatpush.bf16.msrb.mxu2 %v1459_v53 }
 0x303   :  { %885 = vmatpush.bf16.msrb.mxu0 %v1484_v12 }
 0x304   :  { %966 = vmatpush.bf16.msrb.mxu1 %v1467_v60  ;;  %979 = vmatpush.bf16.msrb.mxu2 %v1470_v62 }
 0x307   :  { %886 = vmatpush.bf16.msrb.mxu0 %v1491_v15 }
 0x308   :  { %967 = vmatpush.bf16.msrb.mxu1 %v1478_v8  ;;  %980 = vmatpush.bf16.msrb.mxu2 %v1481_v9 }
 0x367   :  { %v648_v11 = vpop.f32.mrf.mxu0  ;;  %v661_v19 = vpop.f32.mrf.mxu1 }
 0x368   :  { %v678_v22 = vadd.f32 %v648_v11, %v635_v7  ;;  %v679_v30 = vadd.f32 %v661_v19, %v636_v10 }
 0x36a   :  { %v1193_v31 = vmul.f32 -1.442695, %v678_v22  ;;  %v1194_v39 = vmul.f32 -1.442695, %v679_v30 }
 0x36c   :  { %1297 = vpow2.f32 %v1193_v31 }
 0x36d   :  { %1299 = vpow2.f32 %v1194_v39 }
 0x36e   :  { %v674_v44 = vpop.f32.mrf.mxu2 }
 0x36f   :  { %v650_v51 = vpop.f32.mrf.mxu0  ;;  %v663_v53 = vpop.f32.mrf.mxu1  ;;  %v718_v48 = vadd.f32 %v1558_v52, %v674_v44 }
 0x372   :  { %v1298_v60 = vpop.eup %1297 }
 0x373   :  { %v1300_v62 = vpop.eup %1299  ;;  %v686_v8 = vadd.f32 1.0, %v1298_v60 }
 0x374   :  { %v687_v9 = vadd.f32 1.0, %v1300_v62 }
 0x375   :  { %1301 = vrcp.f32 %v686_v8  ;;  %v699_v14 = vand.u32 2147483648, %v686_v8  ;;  %v697_v17 = vand.u32 2147483647, %v686_v8  ;;  %vm693_vm14 = vweird.f32 %v686_v8 }
 0x376   :  { %1303 = vrcp.f32 %v687_v9  ;;  %v676_v29 = vpop.f32.mrf.mxu2  ;;  %v714_v33 = vand.u32 2147483648, %v687_v9  ;;  %vm708_vm2 = vweird.f32 %v687_v9  ;;  %v712_v34 = vand.u32 2147483647, %v687_v9 }
 0x377   :  { %v700_v24 = vor.u32 1.1754944e-38, %v699_v14  ;;  %vm698_vm0 = vcmp.eq.f32.partialorder %v697_v17, 8.507059e+37  ;;  %v1198_v29 = vld [vmem:[%s1802_s1 + $0x44] sm:$0xf] }
 0x378   :  { %v715_v43 = vor.u32 1.1754944e-38, %v714_v33  ;;  %vm713_vm4 = vcmp.eq.f32.partialorder %v712_v34, 8.507059e+37 }
 0x37b   :  { %v1302_v0 = vpop.eup %1301 }
 0x37c   :  { %v1304_v2 = vpop.eup %1303  ;;  %v689_v4 = vmul.f32 %v1302_v0, %v686_v8  ;;  %vm694_vm13 = vweird.f32 %v1302_v0 }
 0x37d   :  { %v704_v6 = vmul.f32 %v1304_v2, %v687_v9  ;;  %vm695_vm15 = vmor %vm693_vm14, %vm694_vm13  ;;  %vm709_vm1 = vweird.f32 %v1304_v2 }
 0x37e   :  { %v690_v5 = vsub.f32 1.0, %v689_v4  ;;  %vm710_vm3 = vmor %vm708_vm2, %vm709_vm1 }
 0x37f   :  { %v705_v36 = vsub.f32 1.0, %v704_v6  ;;  %v744_v6 = vunpack.c.l.bf16 %v1198_v29 }
 0x380   :  { %v691_v16 = vmul.f32 %v1302_v0, %v690_v5 }
 0x381   :  { %v706_v21 = vmul.f32 %v1304_v2, %v705_v36 }
 0x382   :  { %v692_v23 = vadd.f32 %v1302_v0, %v691_v16 }
 0x383   :  { %v707_v28 = vadd.f32 %v1304_v2, %v706_v21 }
 0x384   :  { %v696_v25 = vsel %vm695_vm15, %v1302_v0, %v692_v23 }
 0x385   :  { %v701_v27 = vsel %vm698_vm0, %v700_v24, %v696_v25  ;;  %v711_v37 = vsel %vm710_vm3, %v1304_v2, %v707_v28 }
 0x386   :  { %v719_v32 = vmul.f32 %v718_v48, %v701_v27  ;;  %v716_v38 = vsel %vm713_vm4, %v715_v43, %v711_v37  ;;  %v1203_v43 = vld [vmem:[%s1802_s1 + $0x48] sm:$0xff] }
 0x387   :  { %v722_v40 = vsub.f32 1.0, %v716_v38  ;;  %v724_v49 = vmul.f32 %v716_v38, %v1694_v58 }
 0x388   :  { %v720_v63 = vadd.f32 %v719_v32, %v637_v13 }
 0x38a   :  { %1305 = vtanh.f32 %v720_v63 }
 0x390   :  { %v1306_v41 = vpop.eup %1305 }
 0x391   :  { %v723_v45 = vmul.f32 %v1306_v41, %v722_v40  ;;  %v849_v40 = vunpack.c.l.bf16 %v1203_v43  ;;  %v850_v41 = vunpack.c.h.bf16 %v1203_v43 }
 0x393   :  { %v725_v54 = vadd.f32 %v724_v49, %v723_v45 }
 0x395   :  { %v1734_v50 = vsel %vm733_vm5, %v725_v54, %v1694_v58  ;;  %v735_v55 = vsel %vm733_vm5, %v725_v54, 0.0  ;;  %v1197_v58 = vld [vmem:[%s1802_s1 + $0x3c] sm:$0xff] }
 0x396   :  { %v736_v47 = vpack.c.bf16 %v735_v55, %v735_v55  ;;  %v745_v56 = vpack.c.bf16 %v1734_v50, %v1734_v50  ;;  %v743_v59 = vunpack.c.h.bf16 %v1197_v58 }
 0x398   :  { %1196 = vst [vmem:[%s1805_s4 + $0x10] sm:$0xf] %v736_v47  ;;  %754 = vmatmul.bf16.vlgmr.msrb.gmra.mxu3 %v745_v56  ;;  %767 = vmatmul.bf16.vlgmr.msra.gmra.mxu0 %v745_v56 }
 0x399   :  { %780 = vmatmul.bf16.vlgmr.msra.gmra.mxu1 %v745_v56  ;;  %986 = vmatpush.bf16.msrb.mxu3 %v1413_v18 }
 0x39d   :  { %987 = vmatpush.bf16.msrb.mxu3 %v1423_v26 }
 0x3a1   :  { %988 = vmatpush.bf16.msrb.mxu3 %v1433_v35  ;;  %v742_v35 = vunpack.c.l.bf16 %v1197_v58 }
 0x3a5   :  { %989 = vmatpush.bf16.msrb.mxu3 %v1443_v46 }
 0x3a9   :  { %990 = vmatpush.bf16.msrb.mxu3 %v1462_v57 }
 0x3ad   :  { %991 = vmatpush.bf16.msrb.mxu3 %v1473_v1 }
 0x3b1   :  { %992 = vmatpush.bf16.msrb.mxu3 %v1484_v12 }
 0x3b5   :  { %993 = vmatpush.bf16.msrb.mxu3 %v1491_v15 }
 0x415   :  { %v768_v18 = vpop.f32.mrf.mxu0 }
 0x416   :  { %v786_v61 = vadd.f32 %v768_v18, %v743_v59  ;;  %v781_v26 = vpop.f32.mrf.mxu1 }
 0x417   :  { %v825_v4 = vadd.f32 %v1558_v52, %v781_v26  ;;  %v839_v52 = vpop.permute.xlu2 %838 }
 0x418   :  { %v1200_v3 = vmul.f32 -1.442695, %v786_v61  ;;  %vm840_vm14 = vcmp.eq.s32.totalorder %v839_v52, 1 }
 0x41a   :  { %1307 = vpow2.f32 %v1200_v3 }
 0x41b   :  { %v755_v46 = vpop.f32.mrf.mxu3 }
 0x41c   :  { %v785_v7 = vadd.f32 %v755_v46, %v742_v35 }
 0x41d   :  { %v770_v57 = vpop.f32.mrf.mxu0 }
 0x41e   :  { %v1199_v10 = vmul.f32 -1.442695, %v785_v7  ;;  %v783_v1 = vpop.f32.mrf.mxu1 }
 0x420   :  { %v1308_v11 = vpop.eup %1307  ;;  %1309 = vpow2.f32 %v1199_v10 }
 0x421   :  { %v794_v12 = vadd.f32 1.0, %v1308_v11 }
 0x423   :  { %v757_v15 = vpop.f32.mrf.mxu3  ;;  %1311 = vrcp.f32 %v794_v12  ;;  %v821_v16 = vand.u32 2147483648, %v794_v12  ;;  %vm815_vm11 = vweird.f32 %v794_v12  ;;  %v819_v20 = vand.u32 2147483647, %v794_v12 }
 0x424   :  { %v1204_v15 = vld [vmem:[%s1802_s1 + $0x50] sm:$0xf] }
 0x425   :  { %v822_v24 = vor.u32 1.1754944e-38, %v821_v16  ;;  %vm820_vm13 = vcmp.eq.f32.partialorder %v819_v20, 8.507059e+37 }
 0x426   :  { %v1310_v19 = vpop.eup %1309 }
 0x427   :  { %v793_v22 = vadd.f32 1.0, %v1310_v19 }
 0x429   :  { %1313 = vrcp.f32 %v793_v22  ;;  %v1312_v30 = vpop.eup %1311  ;;  %v806_v60 = vand.u32 2147483648, %v793_v22  ;;  %v804_v8 = vand.u32 2147483647, %v793_v22  ;;  %vm800_vm7 = vweird.f32 %v793_v22 }
 0x42a   :  { %v811_v31 = vmul.f32 %v1312_v30, %v794_v12  ;;  %vm816_vm10 = vweird.f32 %v1312_v30 }
 0x42b   :  { %v807_v2 = vor.u32 1.1754944e-38, %v806_v60  ;;  %vm805_vm9 = vcmp.eq.f32.partialorder %v804_v8, 8.507059e+37  ;;  %vm817_vm12 = vmor %vm815_vm11, %vm816_vm10 }
 0x42c   :  { %v812_v51 = vsub.f32 1.0, %v811_v31  ;;  %v1774_v31 = vld [vmem:[%s1804_s3] ss:$0 sm:$0xff] }
 0x42e   :  { %v813_v9 = vmul.f32 %v1312_v30, %v812_v51 }
 0x42f   :  { %v1314_v39 = vpop.eup %1313 }
 0x430   :  { %v796_v44 = vmul.f32 %v1314_v39, %v793_v22  ;;  %vm801_vm6 = vweird.f32 %v1314_v39  ;;  %v814_v36 = vadd.f32 %v1312_v30, %v813_v9 }
 0x431   :  { %vm802_vm8 = vmor %vm800_vm7, %vm801_vm6 }
 0x432   :  { %v797_v53 = vsub.f32 1.0, %v796_v44  ;;  %v818_v23 = vsel %vm817_vm12, %v1312_v30, %v814_v36  ;;  %v851_v44 = vunpack.c.l.bf16 %v1204_v15  ;;  %v946_v36 = vpop.permute.xlu0 %945 }
 0x433   :  { %v823_v13 = vsel %vm820_vm13, %v822_v24, %v818_v23  ;;  %vm947_vm7 = vcmp.eq.s32.totalorder %v946_v36, 1 }
 0x434   :  { %v798_v62 = vmul.f32 %v1314_v39, %v797_v53  ;;  %v829_v25 = vsub.f32 1.0, %v823_v13  ;;  %v831_v28 = vmul.f32 %v823_v13, %v1734_v50  ;;  %v1209_v13 = vld [vmem:[%s1802_s1 + $0x54] sm:$0xff] }
 0x436   :  { %v799_v0 = vadd.f32 %v1314_v39, %v798_v62 }
 0x438   :  { %v803_v5 = vsel %vm802_vm8, %v1314_v39, %v799_v0 }
 0x439   :  { %v808_v14 = vsel %vm805_vm9, %v807_v2, %v803_v5 }
 0x43a   :  { %v826_v17 = vmul.f32 %v825_v4, %v808_v14 }
 0x43c   :  { %v827_v21 = vadd.f32 %v826_v17, %v744_v6 }
 0x43e   :  { %1315 = vtanh.f32 %v827_v21 }
 0x444   :  { %v1316_v48 = vpop.eup %1315 }
 0x445   :  { %v830_v27 = vmul.f32 %v1316_v48, %v829_v25  ;;  %v956_v25 = vunpack.c.l.bf16 %v1209_v13 }
 0x447   :  { %v832_v32 = vadd.f32 %v831_v28, %v830_v27  ;;  %v957_v28 = vunpack.c.h.bf16 %v1209_v13 }
 0x449   :  { %v1758_v33 = vsel %vm840_vm14, %v832_v32, %v1734_v50  ;;  %v842_v34 = vsel %vm840_vm14, %v832_v32, 0.0 }
 0x44a   :  { %v843_v63 = vpack.c.bf16 %v842_v34, %v842_v34  ;;  %v852_v37 = vpack.c.bf16 %v1758_v33, %v1758_v33 }
 0x44c   :  { %1202 = vst [vmem:[%s1805_s4 + $0x14] sm:$0xf] %v843_v63  ;;  %861 = vmatmul.bf16.vlgmr.msra.gmra.mxu2 %v852_v37  ;;  %874 = vmatmul.bf16.vlgmr.msra.gmra.mxu3 %v852_v37 }
 0x44d   :  { %887 = vmatmul.bf16.vlgmr.msrb.gmra.mxu0 %v852_v37 }
 0x4ca   :  { %v888_v38 = vpop.f32.mrf.mxu0 }
 0x4cb   :  { %v932_v39 = vadd.f32 %v1774_v31, %v888_v38 }
 0x4cf   :  { %v862_v42 = vpop.f32.mrf.mxu2  ;;  %v875_v45 = vpop.f32.mrf.mxu3 }
 0x4d0   :  { %v892_v49 = vadd.f32 %v862_v42, %v849_v40  ;;  %v893_v54 = vadd.f32 %v875_v45, %v850_v41 }
 0x4d2   :  { %v1205_v50 = vmul.f32 -1.442695, %v892_v49  ;;  %v1206_v55 = vmul.f32 -1.442695, %v893_v54  ;;  %v890_v47 = vpop.f32.mrf.mxu0 }
 0x4d3   :  { %v1210_v47 = vld [vmem:[%s1802_s1 + $0x5c] sm:$0xf] }
 0x4d4   :  { %1317 = vpow2.f32 %v1205_v50 }
 0x4d5   :  { %1319 = vpow2.f32 %v1206_v55 }
 0x4d7   :  { %v864_v56 = vpop.f32.mrf.mxu2  ;;  %v877_v58 = vpop.f32.mrf.mxu3 }
 0x4da   :  { %v1318_v59 = vpop.eup %1317 }
 0x4db   :  { %v1320_v18 = vpop.eup %1319  ;;  %v900_v61 = vadd.f32 1.0, %v1318_v59 }
 0x4dc   :  { %v901_v26 = vadd.f32 1.0, %v1320_v18 }
 0x4dd   :  { %1321 = vrcp.f32 %v900_v61  ;;  %v913_v10 = vand.u32 2147483648, %v900_v61  ;;  %v911_v12 = vand.u32 2147483647, %v900_v61  ;;  %vm907_vm0 = vweird.f32 %v900_v61 }
 0x4de   :  { %1323 = vrcp.f32 %v901_v26  ;;  %v928_v8 = vand.u32 2147483648, %v901_v26  ;;  %vm922_vm4 = vweird.f32 %v901_v26  ;;  %v926_v9 = vand.u32 2147483647, %v901_v26 }
 0x4df   :  { %v914_v30 = vor.u32 1.1754944e-38, %v913_v10  ;;  %vm912_vm2 = vcmp.eq.f32.partialorder %v911_v12, 8.507059e+37 }
 0x4e0   :  { %v929_v2 = vor.u32 1.1754944e-38, %v928_v8  ;;  %vm927_vm6 = vcmp.eq.f32.partialorder %v926_v9, 8.507059e+37 }
 0x4e3   :  { %v1322_v3 = vpop.eup %1321 }
 0x4e4   :  { %v1324_v35 = vpop.eup %1323  ;;  %v903_v46 = vmul.f32 %v1322_v3, %v900_v61  ;;  %vm908_vm15 = vweird.f32 %v1322_v3 }
 0x4e5   :  { %v918_v7 = vmul.f32 %v1324_v35, %v901_v26  ;;  %vm909_vm1 = vmor %vm907_vm0, %vm908_vm15  ;;  %vm923_vm3 = vweird.f32 %v1324_v35  ;;  %v958_v26 = vunpack.c.l.bf16 %v1210_v47 }
 0x4e6   :  { %v904_v57 = vsub.f32 1.0, %v903_v46  ;;  %vm924_vm5 = vmor %vm922_vm4, %vm923_vm3 }
 0x4e7   :  { %v919_v1 = vsub.f32 1.0, %v918_v7 }
 0x4e8   :  { %v905_v11 = vmul.f32 %v1322_v3, %v904_v57 }
 0x4e9   :  { %v920_v19 = vmul.f32 %v1324_v35, %v919_v1 }
 0x4ea   :  { %v906_v22 = vadd.f32 %v1322_v3, %v905_v11 }
 0x4eb   :  { %v921_v60 = vadd.f32 %v1324_v35, %v920_v19 }
 0x4ec   :  { %v910_v51 = vsel %vm909_vm1, %v1322_v3, %v906_v22 }
 0x4ed   :  { %v915_v53 = vsel %vm912_vm2, %v914_v30, %v910_v51  ;;  %v925_v0 = vsel %vm924_vm5, %v1324_v35, %v921_v60 }
 0x4ee   :  { %v933_v62 = vmul.f32 %v932_v39, %v915_v53  ;;  %v930_v4 = vsel %vm927_vm6, %v929_v2, %v925_v0  ;;  %v1053_v53 = vpop.permute.xlu1 %1052 }
 0x4ef   :  { %v936_v6 = vsub.f32 1.0, %v930_v4  ;;  %v938_v16 = vmul.f32 %v930_v4, %v1758_v33  ;;  %vm1054_vm0 = vcmp.eq.s32.totalorder %v1053_v53, 1 }
 0x4f0   :  { %v934_v29 = vadd.f32 %v933_v62, %v851_v44 }
 0x4f2   :  { %1325 = vtanh.f32 %v934_v29 }
 0x4f8   :  { %v1326_v5 = vpop.eup %1325 }
 0x4f9   :  { %v937_v14 = vmul.f32 %v1326_v5, %v936_v6 }
 0x4fb   :  { %v939_v17 = vadd.f32 %v938_v16, %v937_v14 }
 0x4fd   :  { %v1779_v20 = vsel %vm947_vm7, %v939_v17, %v1758_v33  ;;  %v949_v21 = vsel %vm947_vm7, %v939_v17, 0.0 }
 0x4fe   :  { %v950_v23 = vpack.c.bf16 %v949_v21, %v949_v21  ;;  %v959_v24 = vpack.c.bf16 %v1779_v20, %v1779_v20 }
 0x500   :  { %1208 = vst [vmem:[%s1805_s4 + $0x18] sm:$0xf] %v950_v23  ;;  %968 = vmatmul.bf16.vlgmr.msrb.gmra.mxu1 %v959_v24  ;;  %981 = vmatmul.bf16.vlgmr.msrb.gmra.mxu2 %v959_v24 }
 0x501   :  { %994 = vmatmul.bf16.vlgmr.msrb.gmra.mxu3 %v959_v24 }
 0x57d   :  { %v969_v48 = vpop.f32.mrf.mxu1 }
 0x57e   :  { %v999_v52 = vadd.f32 %v969_v48, %v956_v25 }
 0x580   :  { %v1211_v27 = vmul.f32 -1.442695, %v999_v52 }
 0x582   :  { %1327 = vpow2.f32 %v1211_v27 }
 0x583   :  { %v982_v32 = vpop.f32.mrf.mxu2 }
 0x584   :  { %v1000_v33 = vadd.f32 %v982_v32, %v957_v28  ;;  %v995_v34 = vpop.f32.mrf.mxu3 }
 0x585   :  { %v971_v63 = vpop.f32.mrf.mxu1  ;;  %v1039_v7 = vadd.f32 %v1774_v31, %v995_v34 }
 0x586   :  { %v1212_v37 = vmul.f32 -1.442695, %v1000_v33 }
 0x588   :  { %v1328_v43 = vpop.eup %1327  ;;  %1329 = vpow2.f32 %v1212_v37 }
 0x589   :  { %v1007_v38 = vadd.f32 1.0, %v1328_v43 }
 0x58b   :  { %1331 = vrcp.f32 %v1007_v38  ;;  %v984_v40 = vpop.f32.mrf.mxu2  ;;  %v1020_v55 = vand.u32 2147483648, %v1007_v38  ;;  %v1018_v58 = vand.u32 2147483647, %v1007_v38  ;;  %vm1014_vm9 = vweird.f32 %v1007_v38 }
 0x58c   :  { %v997_v41 = vpop.f32.mrf.mxu3 }
 0x58d   :  { %v1021_v3 = vor.u32 1.1754944e-38, %v1020_v55  ;;  %vm1019_vm11 = vcmp.eq.f32.partialorder %v1018_v58, 8.507059e+37 }
 0x58e   :  { %v1330_v42 = vpop.eup %1329 }
 0x58f   :  { %v1008_v45 = vadd.f32 1.0, %v1330_v42 }
 0x591   :  { %v1332_v49 = vpop.eup %1331  ;;  %1333 = vrcp.f32 %v1008_v45  ;;  %v1035_v1 = vand.u32 2147483648, %v1008_v45  ;;  %v1033_v12 = vand.u32 2147483647, %v1008_v45  ;;  %vm1029_vm13 = vweird.f32 %v1008_v45 }
 0x592   :  { %v1010_v54 = vmul.f32 %v1332_v49, %v1007_v38  ;;  %vm1015_vm8 = vweird.f32 %v1332_v49 }
 0x593   :  { %vm1016_vm10 = vmor %vm1014_vm9, %vm1015_vm8  ;;  %v1036_v22 = vor.u32 1.1754944e-38, %v1035_v1  ;;  %vm1034_vm15 = vcmp.eq.f32.partialorder %v1033_v12, 8.507059e+37 }
 0x594   :  { %v1011_v50 = vsub.f32 1.0, %v1010_v54 }
 0x596   :  { %v1012_v56 = vmul.f32 %v1332_v49, %v1011_v50 }
 0x597   :  { %v1334_v59 = vpop.eup %1333 }
 0x598   :  { %v1025_v18 = vmul.f32 %v1334_v59, %v1008_v45  ;;  %v1013_v61 = vadd.f32 %v1332_v49, %v1012_v56  ;;  %vm1030_vm12 = vweird.f32 %v1334_v59 }
 0x599   :  { %vm1031_vm14 = vmor %vm1029_vm13, %vm1030_vm12 }
 0x59a   :  { %v1026_v35 = vsub.f32 1.0, %v1025_v18  ;;  %v1017_v46 = vsel %vm1016_vm10, %v1332_v49, %v1013_v61 }
 0x59b   :  { %v1022_v57 = vsel %vm1019_vm11, %v1021_v3, %v1017_v46 }
 0x59c   :  { %v1027_v10 = vmul.f32 %v1334_v59, %v1026_v35  ;;  %v1040_v11 = vmul.f32 %v1039_v7, %v1022_v57 }
 0x59e   :  { %v1028_v15 = vadd.f32 %v1334_v59, %v1027_v10  ;;  %v1041_v19 = vadd.f32 %v1040_v11, %v958_v26 }
 0x5a0   :  { %v1032_v30 = vsel %vm1031_vm14, %v1334_v59, %v1028_v15  ;;  %1335 = vtanh.f32 %v1041_v19 }
 0x5a1   :  { %v1037_v39 = vsel %vm1034_vm15, %v1036_v22, %v1032_v30 }
 0x5a2   :  { %v1043_v44 = vsub.f32 1.0, %v1037_v39  ;;  %v1045_v31 = vmul.f32 %v1037_v39, %v1779_v20 }
 0x5a6   :  { %v1336_v51 = vpop.eup %1335 }
 0x5a7   :  { %v1044_v60 = vmul.f32 %v1336_v51, %v1043_v44 }
 0x5a9   :  { %v1046_v62 = vadd.f32 %v1045_v31, %v1044_v60 }
 0x5ab   :  { %v1055_v8 = vsel %vm1054_vm0, %v1046_v62, %v1779_v20  ;;  %v1056_v9 = vsel %vm1054_vm0, %v1046_v62, 0.0 }
 0x5ac   :  { %v1057_v29 = vpack.c.bf16 %v1056_v9, %v1056_v9  ;;  %1064 = vst [vmem:[%s1806_s5] sm:$0xff] %v1055_v8 }
 0x5ae   :  { %1214 = vst [vmem:[%s1805_s4 + $0x1c] sm:$0xf] %v1057_v29 }
 0x5af   :  { %1073 = vsyncpa [#allocation4], 1 }

</bundles_post_ra>
